<compile_context>
chip_gen: v5e
topology: v5e:2x2
jax: 0.10.0
libtpu: 0.0.40
codegen_flags: <defaults>
</compile_context>

<pallas_src>
import math

import jax
import jax.numpy as jnp
from jax import lax
from jax.experimental import pallas as pl
from jax.experimental.pallas import tpu as pltpu  # noqa: F401  (imported per template)

EMBED = 32
N_HEADS = 8
HEAD_DIM = EMBED // N_HEADS
EXPANSION = 4
SEQ = 8
BATCH = 2
N = BATCH * SEQ            # 16 batch-stacked positions
HE = N_HEADS * N           # 128 head-expanded score columns
EPS = 1e-5                 # nn.LayerNorm default
NEG = -1e30                # large finite negative instead of -inf (no NaN hazard)

# --- packed-slab offsets -----------------------------------------------------
# w32 slab (416, 32): row offsets
_WO1, _WQ2, _WK2, _WV2, _WO2 = 0, 32, 64, 96, 128
_WF2, _HM = 160, 288                       # each 128 rows
# w128 slab (65, 128): row offsets
_WQKV1, _WF1, _BF1 = 0, 32, 64
# vec rows inside the (16, 288) bias/vec slab (last 32 lanes)
(_BQ1, _BK1, _BV1, _BO1, _BQ2, _BK2, _BV2, _BO2,
 _G0, _BE0, _G1, _BE1, _G2, _BE2, _BF2) = range(15)


# ---------------------------------------------------------------------------
# Shared math helper (traced both inside the Pallas kernel and in the reference)
# ---------------------------------------------------------------------------
def _layernorm(h, g, b):
    mu = jnp.mean(h, axis=-1, keepdims=True)
    var = jnp.mean((h - mu) ** 2, axis=-1, keepdims=True)
    return (h - mu) * lax.rsqrt(var + EPS) * g + b


# ---------------------------------------------------------------------------
# Pallas kernel: whole (batch-stacked) problem in one invocation
# ---------------------------------------------------------------------------
def decoder_block_kernel(acts_ref, bv_ref, w32_ref, w128_ref, out_ref):
    f32, bf16 = jnp.float32, jnp.bfloat16

    x = acts_ref[0:N, :]                 # (16, 32) decoder input
    enc = acts_ref[N:2 * N, :]           # decoder `key` argument (encoder output)
    val = acts_ref[2 * N:3 * N, :]       # `value`

    bias_self = bv_ref[:, 0:HE]          # (16, 128) additive, pre-tiled per head
    bias_cross = bv_ref[:, HE:2 * HE]
    vecs = bv_ref[:, 2 * HE:2 * HE + EMBED]    # (16, 32) bias / LayerNorm rows

    def row(i):                          # static slice -> (1, E)
        return vecs[i:i + 1, :]

    hm = w32_ref[_HM:_HM + HE, :]        # (128, 32) bf16 0/1 head-block mask
    scale = 1.0 / math.sqrt(HEAD_DIM)

    def tile_heads(t):                   # (16,32) f32 -> head-expanded (128,32) bf16
        return jnp.concatenate([t.astype(bf16)] * N_HEADS, axis=0) * hm

    def attention(q, k, v, bias):
        # q,k,v: (16,32) f32 ; bias: (16,128) additive (0 / -1e30)
        kt = tile_heads(k)
        vt = tile_heads(v)
        # all-heads scores: s[i, h*16+j] = Q_h[i] . K_h[j]   (one lane-dense matmul)
        s = lax.dot_general(q.astype(bf16), kt, (((1,), (1,)), ((), ())),
                            preferred_element_type=f32) * scale + bias
        m = jnp.max(s, axis=-1, keepdims=True)   # full-row max (equiv. up to a shift)
        p = jnp.exp(s - m)                       # masked entries underflow to exactly 0
        pb = p.astype(bf16)
        ctx = jnp.dot(pb, vt, preferred_element_type=f32)   # (16,32) unnormalized
        den = jnp.dot(pb, hm, preferred_element_type=f32)   # per-head denom per column
        return ctx * pl.reciprocal(den, approx=True)

    # ---- decoder self-attention + add & norm (Dropout = identity) ----
    qkv = jnp.dot(x.astype(bf16), w128_ref[_WQKV1:_WQKV1 + EMBED, :],
                  preferred_element_type=f32)                  # (16,128); lanes 96:128 = 0
    q1 = qkv[:, 0:EMBED] + row(_BQ1)
    k1 = qkv[:, EMBED:2 * EMBED] + row(_BK1)
    v1 = qkv[:, 2 * EMBED:3 * EMBED] + row(_BV1)
    ctx1 = attention(q1, k1, v1, bias_self)
    att = jnp.dot(ctx1.astype(bf16), w32_ref[_WO1:_WO1 + EMBED, :],
                  preferred_element_type=f32) + row(_BO1)
    query = _layernorm(att + x, row(_G0), row(_BE0))

    # ---- encoder block: MultiHeadAttention(query=enc, key=query, value=val) ----
    q2 = jnp.dot(enc.astype(bf16), w32_ref[_WQ2:_WQ2 + EMBED, :],
                 preferred_element_type=f32) + row(_BQ2)
    k2 = jnp.dot(query.astype(bf16), w32_ref[_WK2:_WK2 + EMBED, :],
                 preferred_element_type=f32) + row(_BK2)
    v2 = jnp.dot(val.astype(bf16), w32_ref[_WV2:_WV2 + EMBED, :],
                 preferred_element_type=f32) + row(_BV2)
    ctx2 = attention(q2, k2, v2, bias_cross)
    att2 = jnp.dot(ctx2.astype(bf16), w32_ref[_WO2:_WO2 + EMBED, :],
                   preferred_element_type=f32) + row(_BO2)
    n1 = _layernorm(att2 + query, row(_G1), row(_BE1))

    # ---- feed-forward + add & norm ----
    hid = jnp.dot(n1.astype(bf16), w128_ref[_WF1:_WF1 + EMBED, :],
                  preferred_element_type=f32) + w128_ref[_BF1:_BF1 + 1, :].astype(f32)
    hid = jnp.maximum(hid, 0.0)                                # ReLU
    ff = jnp.dot(hid.astype(bf16), w32_ref[_WF2:_WF2 + HE, :],
                 preferred_element_type=f32) + row(_BF2)
    # Output kept (16,32): a lane-dense (4,128) store would need an in-kernel
    # sublane->lane relayout costing more than the two masked stores it saves.
    out_ref[...] = _layernorm(ff + n1, row(_G2), row(_BE2))


# ---------------------------------------------------------------------------
# One-time packing: 26 params + static mask -> 3 slabs (called OUTSIDE the jit path)
# ---------------------------------------------------------------------------
def pack_params(params, mask):
    (wq1, bq1, wk1, bk1, wv1, bv1, wo1, bo1,
     g0, be0,
     wq2, bq2, wk2, bk2, wv2, bv2, wo2, bo2,
     g1, be1, g2, be2,
     wf1, bf1, wf2, bf2) = params
    f32, bf16 = jnp.float32, jnp.bfloat16

    # 0/1 head-block mask: hm[h*N + j, e] = 1  iff  e // HEAD_DIM == h
    r = jnp.arange(HE)[:, None] // N
    c = jnp.arange(EMBED)[None, :] // HEAD_DIM
    hm = (r == c).astype(f32)                                            # (128, 32)

    # (65,128) slab: fused self-attn QKV weight (zero-padded to 128 lanes), FF1 w, FF1 b
    wqkv1 = jnp.concatenate(
        [wq1, wk1, wv1, jnp.zeros((EMBED, HE - 3 * EMBED), f32)], axis=1)
    w128 = jnp.concatenate([wqkv1, wf1, bf1], axis=0).astype(bf16)        # (65, 128)

    # (416,32) slab: all 32-lane-wide weights + head mask
    w32 = jnp.concatenate([wo1, wq2, wk2, wv2, wo2, wf2, hm], axis=0).astype(bf16)

    # additive attention biases for the batch-stacked, head-expanded (16,128) scores
    mask_b = (mask != 0)
    tiled = jnp.tile(mask_b, (BATCH, BATCH))
    grp = jnp.arange(N) // SEQ
    same = grp[:, None] == grp[None, :]
    bias_self = jnp.where(same & ~tiled, 0.0, NEG).astype(f32)            # (16, 16)
    bias_cross = jnp.where(same, 0.0, NEG).astype(f32)

    vec_rows = [bq1, bk1, bv1, bo1, bq2, bk2, bv2, bo2,
                g0, be0, g1, be1, g2, be2, bf2,
                jnp.zeros((1, EMBED), f32)]                               # pad to 16 rows
    biasvec = jnp.concatenate(
        [jnp.tile(bias_self, (1, N_HEADS)),
         jnp.tile(bias_cross, (1, N_HEADS)),
         jnp.concatenate(vec_rows, axis=0)], axis=1)                      # (16, 288)

    return biasvec, w32, w128


# ---------------------------------------------------------------------------
# Wrapper
# ---------------------------------------------------------------------------
@jax.jit
def transformer_decoder_block(key_in, x, value, packed):
    B, S, E = x.shape
    biasvec, w32, w128 = packed
    acts = jnp.concatenate([x.reshape(B * S, E),
                            key_in.reshape(B * S, E),
                            value.reshape(B * S, E)], axis=0)             # (48, 32)
    out2 = pl.pallas_call(
        decoder_block_kernel,
        out_shape=jax.ShapeDtypeStruct((B * S, E), jnp.float32),
        # No grid: whole problem in one invocation (footprint ~0.2 MiB << VMEM on
        # v5e/v6e/v7x).  At larger BATCH, add a leading "parallel" batch grid axis so
        # v7x's two TensorCores split it.
    )(acts, biasvec, w32, w128)
    return out2.reshape(B, S, E)


# ---------------------------------------------------------------------------
# Deterministic parameter init (shapes from TransformerDecoderBlock.__init__)
# ---------------------------------------------------------------------------
def init_params(key):
    ks = jax.random.split(key, 10)

    def lin(k, din, dout):
        kw, kb = jax.random.split(k)
        w = jax.random.normal(kw, (din, dout), jnp.float32) * 0.08
        b = jax.random.normal(kb, (1, dout), jnp.float32) * 0.02
        return w, b

    wq1, bq1 = lin(ks[0], EMBED, EMBED)
    wk1, bk1 = lin(ks[1], EMBED, EMBED)
    wv1, bv1 = lin(ks[2], EMBED, EMBED)
    wo1, bo1 = lin(ks[3], EMBED, EMBED)
    wq2, bq2 = lin(ks[4], EMBED, EMBED)
    wk2, bk2 = lin(ks[5], EMBED, EMBED)
    wv2, bv2 = lin(ks[6], EMBED, EMBED)
    wo2, bo2 = lin(ks[7], EMBED, EMBED)
    wf1, bf1 = lin(ks[8], EMBED, EXPANSION * EMBED)
    wf2, bf2 = lin(ks[9], EXPANSION * EMBED, EMBED)
    ones = jnp.ones((1, EMBED), jnp.float32)
    zeros = jnp.zeros((1, EMBED), jnp.float32)
    return [wq1, bq1, wk1, bk1, wv1, bv1, wo1, bo1,
            ones, zeros,                     # decoder norm
            wq2, bq2, wk2, bk2, wv2, bv2, wo2, bo2,
            ones, zeros, ones, zeros,        # encoder-block norm1, norm2
            wf1, bf1, wf2, bf2]


# ---------------------------------------------------------------------------
# Pure-JAX reference mirroring the PyTorch forward
# ---------------------------------------------------------------------------
def _ref_mha(q_in, k_in, v_in, wq, bq, wk, bk, wv, bv, wo, bo, mask=None):
    B, S, _ = q_in.shape
    Q = q_in @ wq + bq
    K = k_in @ wk + bk
    V = v_in @ wv + bv

    def split(t):
        return t.reshape(B, S, N_HEADS, HEAD_DIM).transpose(0, 2, 1, 3)

    Qh, Kh, Vh = split(Q), split(K), split(V)
    scores = (Qh @ jnp.swapaxes(Kh, -2, -1)) / math.sqrt(HEAD_DIM)
    if mask is not None:
        scores = jnp.where(mask, -jnp.inf, scores)
    attn = jax.nn.softmax(scores, axis=-1)
    out = (attn @ Vh).transpose(0, 2, 1, 3).reshape(B, S, EMBED)
    return out @ wo + bo


def _ref_decoder_block(key_in, x, value, mask_b, p):
    (wq1, bq1, wk1, bk1, wv1, bv1, wo1, bo1,
     g0, be0,
     wq2, bq2, wk2, bk2, wv2, bv2, wo2, bo2,
     g1, be1, g2, be2,
     wf1, bf1, wf2, bf2) = p
    att = _ref_mha(x, x, x, wq1, bq1, wk1, bk1, wv1, bv1, wo1, bo1, mask=mask_b)
    query = _layernorm(att + x, g0, be0)
    att2 = _ref_mha(key_in, query, value, wq2, bq2, wk2, bk2, wv2, bv2, wo2, bo2)
    n1 = _layernorm(att2 + query, g1, be1)
    h = jnp.maximum(n1 @ wf1 + bf1, 0.0)
    ff = h @ wf2 + bf2
    return _layernorm(ff + n1, g2, be2)


if __name__ == "__main__":
    root = jax.random.PRNGKey(0)
    kx, kk, kv = jax.random.split(root, 3)
    x = jax.random.normal(kx, (BATCH, SEQ, EMBED), jnp.float32)
    key_in = jax.random.normal(kk, (BATCH, SEQ, EMBED), jnp.float32)
    value = jax.random.normal(kv, (BATCH, SEQ, EMBED), jnp.float32)
    # causal mask: entries above the diagonal are masked (nonzero = masked)
    mask = jnp.triu(jnp.ones((SEQ, SEQ), jnp.int32), k=1)

    params = init_params(jax.random.PRNGKey(42))
    packed = pack_params(params, mask)     # one-time packing, outside the jitted path

    out = transformer_decoder_block(key_in, x, value, packed)
    out = jax.block_until_ready(out)

    ref = _ref_decoder_block(key_in, x, value,
                             mask[None, None].astype(bool), params)
    assert out.shape == (BATCH, SEQ, EMBED)
    assert bool(jnp.isfinite(out).all())
    max_err = float(jnp.max(jnp.abs(out - ref)))
    assert jnp.allclose(out, ref, atol=5e-2, rtol=5e-2), f"max_err={max_err}"
    print("KERNEL_OK")
</pallas_src>

<mosaic_0001>
module attributes {stable_mosaic.version = 11 : i64} {
  func.func @decoder_block_kernel(%arg0: memref<48x32xf32, #tpu.memory_space<vmem>>, %arg1: memref<16x288xf32, #tpu.memory_space<vmem>>, %arg2: memref<416x32xbf16, #tpu.memory_space<vmem>>, %arg3: memref<65x128xbf16, #tpu.memory_space<vmem>>, %arg4: memref<16x32xf32, #tpu.memory_space<vmem>>) attributes {dimension_semantics = [], scalar_prefetch = 0 : i64, scratch_operands = 0 : i64, tpu.core_type = #tpu.core_type<tc>} {
    %c0 = arith.constant 0 : index
    %c0_0 = arith.constant 0 : index
    %0 = vector.load %arg0[%c0, %c0_0] : memref<48x32xf32, #tpu.memory_space<vmem>>, vector<16x32xf32>
    %c16 = arith.constant 16 : index
    %c0_1 = arith.constant 0 : index
    %1 = vector.load %arg0[%c16, %c0_1] : memref<48x32xf32, #tpu.memory_space<vmem>>, vector<16x32xf32>
    %c32 = arith.constant 32 : index
    %c0_2 = arith.constant 0 : index
    %2 = vector.load %arg0[%c32, %c0_2] : memref<48x32xf32, #tpu.memory_space<vmem>>, vector<16x32xf32>
    %c0_3 = arith.constant 0 : index
    %c0_4 = arith.constant 0 : index
    %3 = vector.load %arg1[%c0_3, %c0_4] : memref<16x288xf32, #tpu.memory_space<vmem>>, vector<16x128xf32>
    %c0_5 = arith.constant 0 : index
    %c128 = arith.constant 128 : index
    %4 = vector.load %arg1[%c0_5, %c128] : memref<16x288xf32, #tpu.memory_space<vmem>>, vector<16x128xf32>
    %c0_6 = arith.constant 0 : index
    %c256 = arith.constant 256 : index
    %5 = vector.load %arg1[%c0_6, %c256] : memref<16x288xf32, #tpu.memory_space<vmem>>, vector<16x32xf32>
    %c288 = arith.constant 288 : index
    %c0_7 = arith.constant 0 : index
    %6 = vector.load %arg2[%c288, %c0_7] : memref<416x32xbf16, #tpu.memory_space<vmem>>, vector<128x32xbf16>
    %7 = arith.truncf %0 : vector<16x32xf32> to vector<16x32xbf16>
    %c0_8 = arith.constant 0 : index
    %c0_9 = arith.constant 0 : index
    %8 = vector.load %arg3[%c0_8, %c0_9] : memref<65x128xbf16, #tpu.memory_space<vmem>>, vector<32x128xbf16>
    %cst = arith.constant dense<0.000000e+00> : vector<16x128xf32>
    %9 = tpu.matmul %7, %8, %cst {dimension_numbers = #tpu.dot_dimension_numbers<[1], [0], [0], [1], [0, 0, 1, 1], [], []>} : vector<16x32xbf16>, vector<32x128xbf16>, vector<16x128xf32> -> vector<16x128xf32>
    %10 = vector.extract_strided_slice %9 {offsets = [0, 0], sizes = [16, 32], strides = [1, 1]} : vector<16x128xf32> to vector<16x32xf32>
    %11 = vector.extract_strided_slice %5 {offsets = [0, 0], sizes = [1, 32], strides = [1, 1]} : vector<16x32xf32> to vector<1x32xf32>
    %12 = vector.broadcast %11 : vector<1x32xf32> to vector<16x32xf32>
    %13 = arith.addf %10, %12 : vector<16x32xf32>
    %14 = vector.extract_strided_slice %9 {offsets = [0, 32], sizes = [16, 32], strides = [1, 1]} : vector<16x128xf32> to vector<16x32xf32>
    %15 = vector.extract_strided_slice %5 {offsets = [1, 0], sizes = [1, 32], strides = [1, 1]} : vector<16x32xf32> to vector<1x32xf32>
    %16 = vector.broadcast %15 : vector<1x32xf32> to vector<16x32xf32>
    %17 = arith.addf %14, %16 : vector<16x32xf32>
    %18 = vector.extract_strided_slice %9 {offsets = [0, 64], sizes = [16, 32], strides = [1, 1]} : vector<16x128xf32> to vector<16x32xf32>
    %19 = vector.extract_strided_slice %5 {offsets = [2, 0], sizes = [1, 32], strides = [1, 1]} : vector<16x32xf32> to vector<1x32xf32>
    %20 = vector.broadcast %19 : vector<1x32xf32> to vector<16x32xf32>
    %21 = arith.addf %18, %20 : vector<16x32xf32>
    %22 = arith.truncf %17 : vector<16x32xf32> to vector<16x32xbf16>
    %23 = tpu.concatenate %22, %22, %22, %22, %22, %22, %22, %22 in 0 : vector<16x32xbf16>, vector<16x32xbf16>, vector<16x32xbf16>, vector<16x32xbf16>, vector<16x32xbf16>, vector<16x32xbf16>, vector<16x32xbf16>, vector<16x32xbf16> -> vector<128x32xbf16>
    %24 = arith.mulf %23, %6 : vector<128x32xbf16>
    %25 = arith.truncf %21 : vector<16x32xf32> to vector<16x32xbf16>
    %26 = tpu.concatenate %25, %25, %25, %25, %25, %25, %25, %25 in 0 : vector<16x32xbf16>, vector<16x32xbf16>, vector<16x32xbf16>, vector<16x32xbf16>, vector<16x32xbf16>, vector<16x32xbf16>, vector<16x32xbf16>, vector<16x32xbf16> -> vector<128x32xbf16>
    %27 = arith.mulf %26, %6 : vector<128x32xbf16>
    %28 = arith.truncf %13 : vector<16x32xf32> to vector<16x32xbf16>
    %cst_10 = arith.constant dense<0.000000e+00> : vector<16x128xf32>
    %29 = tpu.matmul %28, %24, %cst_10 {dimension_numbers = #tpu.dot_dimension_numbers<[1], [1], [0], [0], [0, 0, 1, 0], [], []>} : vector<16x32xbf16>, vector<128x32xbf16>, vector<16x128xf32> -> vector<16x128xf32>
    %cst_11 = arith.constant 5.000000e-01 : f32
    %30 = vector.broadcast %cst_11 : f32 to vector<16x128xf32>
    %31 = arith.mulf %29, %30 : vector<16x128xf32>
    %32 = arith.addf %31, %3 : vector<16x128xf32>
    %cst_12 = arith.constant dense<0xFF800000> : vector<16xf32>
    %33 = vector.multi_reduction <maximumf>, %32, %cst_12 [1] : vector<16x128xf32> to vector<16xf32>
    %34 = vector.shape_cast %33 : vector<16xf32> to vector<16x1xf32>
    %35 = vector.broadcast %34 : vector<16x1xf32> to vector<16x128xf32>
    %36 = arith.subf %32, %35 : vector<16x128xf32>
    %37 = math.exp %36 : vector<16x128xf32>
    %38 = arith.truncf %37 : vector<16x128xf32> to vector<16x128xbf16>
    %cst_13 = arith.constant dense<0.000000e+00> : vector<16x32xf32>
    %39 = tpu.matmul %38, %27, %cst_13 {dimension_numbers = #tpu.dot_dimension_numbers<[1], [0], [0], [1], [0, 0, 1, 1], [], []>} : vector<16x128xbf16>, vector<128x32xbf16>, vector<16x32xf32> -> vector<16x32xf32>
    %cst_14 = arith.constant dense<0.000000e+00> : vector<16x32xf32>
    %40 = tpu.matmul %38, %6, %cst_14 {dimension_numbers = #tpu.dot_dimension_numbers<[1], [0], [0], [1], [0, 0, 1, 1], [], []>} : vector<16x128xbf16>, vector<128x32xbf16>, vector<16x32xf32> -> vector<16x32xf32>
    %41 = tpu.reciprocal %40 {approx = true} : vector<16x32xf32> -> vector<16x32xf32>
    %42 = arith.mulf %39, %41 : vector<16x32xf32>
    %43 = arith.truncf %42 : vector<16x32xf32> to vector<16x32xbf16>
    %c0_15 = arith.constant 0 : index
    %c0_16 = arith.constant 0 : index
    %44 = vector.load %arg2[%c0_15, %c0_16] : memref<416x32xbf16, #tpu.memory_space<vmem>>, vector<32x32xbf16>
    %cst_17 = arith.constant dense<0.000000e+00> : vector<16x32xf32>
    %45 = tpu.matmul %43, %44, %cst_17 {dimension_numbers = #tpu.dot_dimension_numbers<[1], [0], [0], [1], [0, 0, 1, 1], [], []>} : vector<16x32xbf16>, vector<32x32xbf16>, vector<16x32xf32> -> vector<16x32xf32>
    %46 = vector.extract_strided_slice %5 {offsets = [3, 0], sizes = [1, 32], strides = [1, 1]} : vector<16x32xf32> to vector<1x32xf32>
    %47 = vector.broadcast %46 : vector<1x32xf32> to vector<16x32xf32>
    %48 = arith.addf %45, %47 : vector<16x32xf32>
    %49 = arith.addf %48, %0 : vector<16x32xf32>
    %50 = vector.extract_strided_slice %5 {offsets = [8, 0], sizes = [1, 32], strides = [1, 1]} : vector<16x32xf32> to vector<1x32xf32>
    %51 = vector.extract_strided_slice %5 {offsets = [9, 0], sizes = [1, 32], strides = [1, 1]} : vector<16x32xf32> to vector<1x32xf32>
    %cst_18 = arith.constant dense<0.000000e+00> : vector<16xf32>
    %52 = vector.multi_reduction <add>, %49, %cst_18 [1] : vector<16x32xf32> to vector<16xf32>
    %53 = vector.shape_cast %52 : vector<16xf32> to vector<16x1xf32>
    %cst_19 = arith.constant 3.200000e+01 : f32
    %54 = vector.broadcast %cst_19 : f32 to vector<16x1xf32>
    %55 = arith.divf %53, %54 : vector<16x1xf32>
    %56 = vector.broadcast %55 : vector<16x1xf32> to vector<16x32xf32>
    %57 = arith.subf %49, %56 : vector<16x32xf32>
    %58 = arith.mulf %57, %57 : vector<16x32xf32>
    %cst_20 = arith.constant dense<0.000000e+00> : vector<16xf32>
    %59 = vector.multi_reduction <add>, %58, %cst_20 [1] : vector<16x32xf32> to vector<16xf32>
    %60 = vector.shape_cast %59 : vector<16xf32> to vector<16x1xf32>
    %cst_21 = arith.constant 3.200000e+01 : f32
    %61 = vector.broadcast %cst_21 : f32 to vector<16x1xf32>
    %62 = arith.divf %60, %61 : vector<16x1xf32>
    %63 = vector.broadcast %55 : vector<16x1xf32> to vector<16x32xf32>
    %64 = arith.subf %49, %63 : vector<16x32xf32>
    %cst_22 = arith.constant 9.99999974E-6 : f32
    %65 = vector.broadcast %cst_22 : f32 to vector<16x1xf32>
    %66 = arith.addf %62, %65 : vector<16x1xf32>
    %67 = math.rsqrt %66 : vector<16x1xf32>
    %68 = vector.broadcast %67 : vector<16x1xf32> to vector<16x32xf32>
    %69 = arith.mulf %64, %68 : vector<16x32xf32>
    %70 = vector.broadcast %50 : vector<1x32xf32> to vector<16x32xf32>
    %71 = arith.mulf %69, %70 : vector<16x32xf32>
    %72 = vector.broadcast %51 : vector<1x32xf32> to vector<16x32xf32>
    %73 = arith.addf %71, %72 : vector<16x32xf32>
    %74 = arith.truncf %1 : vector<16x32xf32> to vector<16x32xbf16>
    %c32_23 = arith.constant 32 : index
    %c0_24 = arith.constant 0 : index
    %75 = vector.load %arg2[%c32_23, %c0_24] : memref<416x32xbf16, #tpu.memory_space<vmem>>, vector<32x32xbf16>
    %cst_25 = arith.constant dense<0.000000e+00> : vector<16x32xf32>
    %76 = tpu.matmul %74, %75, %cst_25 {dimension_numbers = #tpu.dot_dimension_numbers<[1], [0], [0], [1], [0, 0, 1, 1], [], []>} : vector<16x32xbf16>, vector<32x32xbf16>, vector<16x32xf32> -> vector<16x32xf32>
    %77 = vector.extract_strided_slice %5 {offsets = [4, 0], sizes = [1, 32], strides = [1, 1]} : vector<16x32xf32> to vector<1x32xf32>
    %78 = vector.broadcast %77 : vector<1x32xf32> to vector<16x32xf32>
    %79 = arith.addf %76, %78 : vector<16x32xf32>
    %80 = arith.truncf %73 : vector<16x32xf32> to vector<16x32xbf16>
    %c64 = arith.constant 64 : index
    %c0_26 = arith.constant 0 : index
    %81 = vector.load %arg2[%c64, %c0_26] : memref<416x32xbf16, #tpu.memory_space<vmem>>, vector<32x32xbf16>
    %cst_27 = arith.constant dense<0.000000e+00> : vector<16x32xf32>
    %82 = tpu.matmul %80, %81, %cst_27 {dimension_numbers = #tpu.dot_dimension_numbers<[1], [0], [0], [1], [0, 0, 1, 1], [], []>} : vector<16x32xbf16>, vector<32x32xbf16>, vector<16x32xf32> -> vector<16x32xf32>
    %83 = vector.extract_strided_slice %5 {offsets = [5, 0], sizes = [1, 32], strides = [1, 1]} : vector<16x32xf32> to vector<1x32xf32>
    %84 = vector.broadcast %83 : vector<1x32xf32> to vector<16x32xf32>
    %85 = arith.addf %82, %84 : vector<16x32xf32>
    %86 = arith.truncf %2 : vector<16x32xf32> to vector<16x32xbf16>
    %c96 = arith.constant 96 : index
    %c0_28 = arith.constant 0 : index
    %87 = vector.load %arg2[%c96, %c0_28] : memref<416x32xbf16, #tpu.memory_space<vmem>>, vector<32x32xbf16>
    %cst_29 = arith.constant dense<0.000000e+00> : vector<16x32xf32>
    %88 = tpu.matmul %86, %87, %cst_29 {dimension_numbers = #tpu.dot_dimension_numbers<[1], [0], [0], [1], [0, 0, 1, 1], [], []>} : vector<16x32xbf16>, vector<32x32xbf16>, vector<16x32xf32> -> vector<16x32xf32>
    %89 = vector.extract_strided_slice %5 {offsets = [6, 0], sizes = [1, 32], strides = [1, 1]} : vector<16x32xf32> to vector<1x32xf32>
    %90 = vector.broadcast %89 : vector<1x32xf32> to vector<16x32xf32>
    %91 = arith.addf %88, %90 : vector<16x32xf32>
    %92 = arith.truncf %85 : vector<16x32xf32> to vector<16x32xbf16>
    %93 = tpu.concatenate %92, %92, %92, %92, %92, %92, %92, %92 in 0 : vector<16x32xbf16>, vector<16x32xbf16>, vector<16x32xbf16>, vector<16x32xbf16>, vector<16x32xbf16>, vector<16x32xbf16>, vector<16x32xbf16>, vector<16x32xbf16> -> vector<128x32xbf16>
    %94 = arith.mulf %93, %6 : vector<128x32xbf16>
    %95 = arith.truncf %91 : vector<16x32xf32> to vector<16x32xbf16>
    %96 = tpu.concatenate %95, %95, %95, %95, %95, %95, %95, %95 in 0 : vector<16x32xbf16>, vector<16x32xbf16>, vector<16x32xbf16>, vector<16x32xbf16>, vector<16x32xbf16>, vector<16x32xbf16>, vector<16x32xbf16>, vector<16x32xbf16> -> vector<128x32xbf16>
    %97 = arith.mulf %96, %6 : vector<128x32xbf16>
    %98 = arith.truncf %79 : vector<16x32xf32> to vector<16x32xbf16>
    %cst_30 = arith.constant dense<0.000000e+00> : vector<16x128xf32>
    %99 = tpu.matmul %98, %94, %cst_30 {dimension_numbers = #tpu.dot_dimension_numbers<[1], [1], [0], [0], [0, 0, 1, 0], [], []>} : vector<16x32xbf16>, vector<128x32xbf16>, vector<16x128xf32> -> vector<16x128xf32>
    %cst_31 = arith.constant 5.000000e-01 : f32
    %100 = vector.broadcast %cst_31 : f32 to vector<16x128xf32>
    %101 = arith.mulf %99, %100 : vector<16x128xf32>
    %102 = arith.addf %101, %4 : vector<16x128xf32>
    %cst_32 = arith.constant dense<0xFF800000> : vector<16xf32>
    %103 = vector.multi_reduction <maximumf>, %102, %cst_32 [1] : vector<16x128xf32> to vector<16xf32>
    %104 = vector.shape_cast %103 : vector<16xf32> to vector<16x1xf32>
    %105 = vector.broadcast %104 : vector<16x1xf32> to vector<16x128xf32>
    %106 = arith.subf %102, %105 : vector<16x128xf32>
    %107 = math.exp %106 : vector<16x128xf32>
    %108 = arith.truncf %107 : vector<16x128xf32> to vector<16x128xbf16>
    %cst_33 = arith.constant dense<0.000000e+00> : vector<16x32xf32>
    %109 = tpu.matmul %108, %97, %cst_33 {dimension_numbers = #tpu.dot_dimension_numbers<[1], [0], [0], [1], [0, 0, 1, 1], [], []>} : vector<16x128xbf16>, vector<128x32xbf16>, vector<16x32xf32> -> vector<16x32xf32>
    %cst_34 = arith.constant dense<0.000000e+00> : vector<16x32xf32>
    %110 = tpu.matmul %108, %6, %cst_34 {dimension_numbers = #tpu.dot_dimension_numbers<[1], [0], [0], [1], [0, 0, 1, 1], [], []>} : vector<16x128xbf16>, vector<128x32xbf16>, vector<16x32xf32> -> vector<16x32xf32>
    %111 = tpu.reciprocal %110 {approx = true} : vector<16x32xf32> -> vector<16x32xf32>
    %112 = arith.mulf %109, %111 : vector<16x32xf32>
    %113 = arith.truncf %112 : vector<16x32xf32> to vector<16x32xbf16>
    %c128_35 = arith.constant 128 : index
    %c0_36 = arith.constant 0 : index
    %114 = vector.load %arg2[%c128_35, %c0_36] : memref<416x32xbf16, #tpu.memory_space<vmem>>, vector<32x32xbf16>
    %cst_37 = arith.constant dense<0.000000e+00> : vector<16x32xf32>
    %115 = tpu.matmul %113, %114, %cst_37 {dimension_numbers = #tpu.dot_dimension_numbers<[1], [0], [0], [1], [0, 0, 1, 1], [], []>} : vector<16x32xbf16>, vector<32x32xbf16>, vector<16x32xf32> -> vector<16x32xf32>
    %116 = vector.extract_strided_slice %5 {offsets = [7, 0], sizes = [1, 32], strides = [1, 1]} : vector<16x32xf32> to vector<1x32xf32>
    %117 = vector.broadcast %116 : vector<1x32xf32> to vector<16x32xf32>
    %118 = arith.addf %115, %117 : vector<16x32xf32>
    %119 = arith.addf %118, %73 : vector<16x32xf32>
    %120 = vector.extract_strided_slice %5 {offsets = [10, 0], sizes = [1, 32], strides = [1, 1]} : vector<16x32xf32> to vector<1x32xf32>
    %121 = vector.extract_strided_slice %5 {offsets = [11, 0], sizes = [1, 32], strides = [1, 1]} : vector<16x32xf32> to vector<1x32xf32>
    %cst_38 = arith.constant dense<0.000000e+00> : vector<16xf32>
    %122 = vector.multi_reduction <add>, %119, %cst_38 [1] : vector<16x32xf32> to vector<16xf32>
    %123 = vector.shape_cast %122 : vector<16xf32> to vector<16x1xf32>
    %cst_39 = arith.constant 3.200000e+01 : f32
    %124 = vector.broadcast %cst_39 : f32 to vector<16x1xf32>
    %125 = arith.divf %123, %124 : vector<16x1xf32>
    %126 = vector.broadcast %125 : vector<16x1xf32> to vector<16x32xf32>
    %127 = arith.subf %119, %126 : vector<16x32xf32>
    %128 = arith.mulf %127, %127 : vector<16x32xf32>
    %cst_40 = arith.constant dense<0.000000e+00> : vector<16xf32>
    %129 = vector.multi_reduction <add>, %128, %cst_40 [1] : vector<16x32xf32> to vector<16xf32>
    %130 = vector.shape_cast %129 : vector<16xf32> to vector<16x1xf32>
    %cst_41 = arith.constant 3.200000e+01 : f32
    %131 = vector.broadcast %cst_41 : f32 to vector<16x1xf32>
    %132 = arith.divf %130, %131 : vector<16x1xf32>
    %133 = vector.broadcast %125 : vector<16x1xf32> to vector<16x32xf32>
    %134 = arith.subf %119, %133 : vector<16x32xf32>
    %cst_42 = arith.constant 9.99999974E-6 : f32
    %135 = vector.broadcast %cst_42 : f32 to vector<16x1xf32>
    %136 = arith.addf %132, %135 : vector<16x1xf32>
    %137 = math.rsqrt %136 : vector<16x1xf32>
    %138 = vector.broadcast %137 : vector<16x1xf32> to vector<16x32xf32>
    %139 = arith.mulf %134, %138 : vector<16x32xf32>
    %140 = vector.broadcast %120 : vector<1x32xf32> to vector<16x32xf32>
    %141 = arith.mulf %139, %140 : vector<16x32xf32>
    %142 = vector.broadcast %121 : vector<1x32xf32> to vector<16x32xf32>
    %143 = arith.addf %141, %142 : vector<16x32xf32>
    %144 = arith.truncf %143 : vector<16x32xf32> to vector<16x32xbf16>
    %c32_43 = arith.constant 32 : index
    %c0_44 = arith.constant 0 : index
    %145 = vector.load %arg3[%c32_43, %c0_44] : memref<65x128xbf16, #tpu.memory_space<vmem>>, vector<32x128xbf16>
    %cst_45 = arith.constant dense<0.000000e+00> : vector<16x128xf32>
    %146 = tpu.matmul %144, %145, %cst_45 {dimension_numbers = #tpu.dot_dimension_numbers<[1], [0], [0], [1], [0, 0, 1, 1], [], []>} : vector<16x32xbf16>, vector<32x128xbf16>, vector<16x128xf32> -> vector<16x128xf32>
    %c64_46 = arith.constant 64 : index
    %c0_47 = arith.constant 0 : index
    %147 = vector.load %arg3[%c64_46, %c0_47] : memref<65x128xbf16, #tpu.memory_space<vmem>>, vector<1x128xbf16>
    %148 = arith.extf %147 : vector<1x128xbf16> to vector<1x128xf32>
    %149 = vector.broadcast %148 : vector<1x128xf32> to vector<16x128xf32>
    %150 = arith.addf %146, %149 : vector<16x128xf32>
    %cst_48 = arith.constant 0.000000e+00 : f32
    %151 = vector.broadcast %cst_48 : f32 to vector<16x128xf32>
    %152 = arith.maximumf %150, %151 : vector<16x128xf32>
    %153 = arith.truncf %152 : vector<16x128xf32> to vector<16x128xbf16>
    %c160 = arith.constant 160 : index
    %c0_49 = arith.constant 0 : index
    %154 = vector.load %arg2[%c160, %c0_49] : memref<416x32xbf16, #tpu.memory_space<vmem>>, vector<128x32xbf16>
    %cst_50 = arith.constant dense<0.000000e+00> : vector<16x32xf32>
    %155 = tpu.matmul %153, %154, %cst_50 {dimension_numbers = #tpu.dot_dimension_numbers<[1], [0], [0], [1], [0, 0, 1, 1], [], []>} : vector<16x128xbf16>, vector<128x32xbf16>, vector<16x32xf32> -> vector<16x32xf32>
    %156 = vector.extract_strided_slice %5 {offsets = [14, 0], sizes = [1, 32], strides = [1, 1]} : vector<16x32xf32> to vector<1x32xf32>
    %157 = vector.broadcast %156 : vector<1x32xf32> to vector<16x32xf32>
    %158 = arith.addf %155, %157 : vector<16x32xf32>
    %159 = arith.addf %158, %143 : vector<16x32xf32>
    %160 = vector.extract_strided_slice %5 {offsets = [12, 0], sizes = [1, 32], strides = [1, 1]} : vector<16x32xf32> to vector<1x32xf32>
    %161 = vector.extract_strided_slice %5 {offsets = [13, 0], sizes = [1, 32], strides = [1, 1]} : vector<16x32xf32> to vector<1x32xf32>
    %cst_51 = arith.constant dense<0.000000e+00> : vector<16xf32>
    %162 = vector.multi_reduction <add>, %159, %cst_51 [1] : vector<16x32xf32> to vector<16xf32>
    %163 = vector.shape_cast %162 : vector<16xf32> to vector<16x1xf32>
    %cst_52 = arith.constant 3.200000e+01 : f32
    %164 = vector.broadcast %cst_52 : f32 to vector<16x1xf32>
    %165 = arith.divf %163, %164 : vector<16x1xf32>
    %166 = vector.broadcast %165 : vector<16x1xf32> to vector<16x32xf32>
    %167 = arith.subf %159, %166 : vector<16x32xf32>
    %168 = arith.mulf %167, %167 : vector<16x32xf32>
    %cst_53 = arith.constant dense<0.000000e+00> : vector<16xf32>
    %169 = vector.multi_reduction <add>, %168, %cst_53 [1] : vector<16x32xf32> to vector<16xf32>
    %170 = vector.shape_cast %169 : vector<16xf32> to vector<16x1xf32>
    %cst_54 = arith.constant 3.200000e+01 : f32
    %171 = vector.broadcast %cst_54 : f32 to vector<16x1xf32>
    %172 = arith.divf %170, %171 : vector<16x1xf32>
    %173 = vector.broadcast %165 : vector<16x1xf32> to vector<16x32xf32>
    %174 = arith.subf %159, %173 : vector<16x32xf32>
    %cst_55 = arith.constant 9.99999974E-6 : f32
    %175 = vector.broadcast %cst_55 : f32 to vector<16x1xf32>
    %176 = arith.addf %172, %175 : vector<16x1xf32>
    %177 = math.rsqrt %176 : vector<16x1xf32>
    %178 = vector.broadcast %177 : vector<16x1xf32> to vector<16x32xf32>
    %179 = arith.mulf %174, %178 : vector<16x32xf32>
    %180 = vector.broadcast %160 : vector<1x32xf32> to vector<16x32xf32>
    %181 = arith.mulf %179, %180 : vector<16x32xf32>
    %182 = vector.broadcast %161 : vector<1x32xf32> to vector<16x32xf32>
    %183 = arith.addf %181, %182 : vector<16x32xf32>
    %c0_56 = arith.constant 0 : index
    %c0_57 = arith.constant 0 : index
    %184 = vector.load %arg4[%c0_56, %c0_57] : memref<16x32xf32, #tpu.memory_space<vmem>>, vector<16x32xf32>
    tpu.vector_store %arg4[%c0_56, %c0_57], %183 {strides = array<i32>} : memref<16x32xf32, #tpu.memory_space<vmem>>, vector<16x32xf32>,
    return
  }
}

</mosaic_0001>

<bundles_post_ra>
// kernel: transformer_decoder_block.1
= control target key start
LH: loop header
LB: loop body
LE: loop exit
PB: predicated region body
PF: predicated region fallthrough
CT: control target
= control target key end

     0   :  { %s1425_s7 = smov 32   ;;  %s1931_s0 = inlined_call_operand.vmem [shape: f32[48,32], index: 0, kind: input, shape index: {}]   ;;  %s1932_s1 = inlined_call_operand.vmem [shape: f32[16,288], index: 1, kind: input, shape index: {}]   ;;  %s1933_s2 = inlined_call_operand.vmem [shape: bf16[416,32], index: 2, kind: input, shape index: {}]   ;;  %s1934_s3 = inlined_call_operand.vmem [shape: bf16[65,128], index: 3, kind: input, shape index: {}]   ;;  %s1935_s4 = inlined_call_operand.hbm [shape: f32[16,32], index: 4, kind: output, shape index: {}]  }
   0x1   :  { %v1260_v0 = vld [vmem:[%s1934_s3 + $0x8] sm:$0xff]  ;;  %v1259_v1 = vld [vmem:[%s1934_s3] sm:$0xff]  ;;  %v1466_v2 = vld [vmem:[%s1932_s1 + $0x10] sm:$0xff] }
   0x2   :  { %v43_v3 = vld [vmem:[%s1933_s2 + $0xc0] sm:$0xff]   ;;  %74 = vmatpush.bf16.msra.mxu0 %v1260_v0  ;;  %v1479_v5 = vld [vmem:[%s1931_s0 + $0x8] sm:$0xff]  ;;  %v85_v6 = vperm.slane %v1466_v2, 1  ;;  %v41_v10 = vld [vmem:[%s1933_s2 + $0xb8] sm:$0xff]  }
   0x3   :  { %v1474_v4 = vld [vmem:[%s1931_s0] sm:$0xff]  ;;  %v1482_v7 = vunpack.c.l.bf16 %v43_v3  ;;  %v1484_v8 = vunpack.c.h.bf16 %v43_v3  ;;  %v45_v9 = vld [vmem:[%s1933_s2 + $0xc8] sm:$0xff]   ;;  %v39_v11 = vld [vmem:[%s1933_s2 + $0xb0] sm:$0xff]  }
   0x4   :  { %87 = vrot.lane.b32.xlu0 %v85_v6, %s1425_s7  ;;  %v1500_v13 = vunpack.c.l.bf16 %v45_v9  ;;  %v1502_v14 = vunpack.c.h.bf16 %v45_v9  ;;  %v1504_v15 = vunpack.c.l.bf16 %v39_v11 }
   0x5   :  { %v1498_v12 = vpack.i.bf16 %v1484_v8, %v1482_v7 }
   0x6   :  { %9 = vsyncpa [#allocation3], 0  ;;  %v47_v16 = vpack.c.bf16 %v1479_v5, %v1474_v4  ;;  %v1508_v17 = vunpack.c.h.bf16 %v39_v11  ;;  %75 = vmatpush.bf16.msra.mxu0 %v1259_v1  ;;  %vm64_vm0 = vcmask 261120   ;;  %v1512_v18 = vunpack.c.l.bf16 %v41_v10  ;;  %v37_v20 = vld [vmem:[%s1933_s2 + $0xa8] sm:$0xff]   ;;  %v35_v23 = vld [vmem:[%s1933_s2 + $0xa0] sm:$0xff]   ;;  %s1426_s16 = smov 96  }
   0x7   :  { %1294 = vrot.lane.b32.xlu1 %v1498_v12, %s1425_s7  ;;  %v1514_v19 = vunpack.c.h.bf16 %v41_v10  ;;  %v1525_v22 = vpack.i.bf16 %v1502_v14, %v1500_v13  ;;  %v1533_v24 = vunpack.c.l.bf16 %v37_v20  ;;  %v1535_v25 = vunpack.c.h.bf16 %v37_v20  ;;  %v33_v30 = vld [vmem:[%s1933_s2 + $0x98] sm:$0xff]   ;;  %v31_v9 = vld [vmem:[%s1933_s2 + $0x90] sm:$0xff]   ;;  %s1427_s17 = smov 64   ;;  %s1430_s18 = smov 128  }
   0x8   :  { %v1521_v21 = vpack.i.bf16 %v1508_v17, %v1504_v15  ;;  %v1543_v27 = vunpack.c.l.bf16 %v35_v23  ;;  %v1545_v28 = vunpack.c.h.bf16 %v35_v23  ;;  %v1562_v32 = vunpack.c.l.bf16 %v33_v30  ;;  %s1431_s19 = smov 8  }
   0x9   :  { %1130 = vmatmul.msk.bf16.vlgmr.msra.gmra.mxu0 %vm64_vm0, %v47_v16  ;;  %v1539_v26 = vpack.i.bf16 %v1514_v19, %v1512_v18  ;;  %v1549_v29 = vpack.i.bf16 %v1535_v25, %v1533_v24  ;;  %v1564_v33 = vunpack.c.h.bf16 %v33_v30  ;;  %v1595_v23 = vunpack.c.l.bf16 %v31_v9 }
   0xa   :  { %1304 = vrot.lane.b32.xlu2 %v1521_v21, %s1425_s7  ;;  %v1558_v31 = vpack.i.bf16 %v1545_v28, %v1543_v27  ;;  %v1597_v30 = vunpack.c.h.bf16 %v31_v9 }
   0xb   :  { %v1570_v34 = vpack.i.bf16 %v1564_v33, %v1562_v32 }
   0xc   :  { %1289 = vrot.lane.b32.xlu0 %v1525_v22, %s1425_s7 }
   0xf   :  { %1299 = vrot.lane.b32.xlu1 %v1539_v26, %s1425_s7 }
  0x12   :  { %1309 = vrot.lane.b32.xlu2 %v1549_v29, %s1425_s7 }
  0x14   :  { %1314 = vrot.lane.b32.xlu0 %v1558_v31, %s1425_s7 }
  0x1a   :  { %1319 = vrot.lane.b32.xlu2 %v1570_v34, %s1425_s7 }
  0x64   :  { %v1305_v40 = vpop.permute.xlu2 %1304 }
  0x65   :  { %v1307_v11 = vunpack.i.h.bf16 %v1305_v40  ;;  %v1306_v16 = vunpack.i.l.bf16 %v1305_v40 }
  0x6c   :  { %v1310_v58 = vpop.permute.xlu2 %1309 }
  0x74   :  { %v1320_v40 = vpop.permute.xlu2 %1319 }
  0x76   :  { %v88_v35 = vpop.permute.xlu0 %87 }
  0x79   :  { %v1295_v37 = vpop.permute.xlu1 %1294 }
  0x7a   :  { %v1297_v53 = vunpack.i.h.bf16 %v1295_v37  ;;  %v1296_v54 = vunpack.i.l.bf16 %v1295_v37 }
  0x7e   :  { %v1290_v39 = vpop.permute.xlu0 %1289 }
  0x7f   :  { %v1292_v51 = vunpack.i.h.bf16 %v1290_v39  ;;  %v1291_v52 = vunpack.i.l.bf16 %v1290_v39 }
  0x81   :  { %v1300_v45 = vpop.permute.xlu1 %1299 }
  0x82   :  { %v1302_v49 = vunpack.i.h.bf16 %v1300_v45  ;;  %v1301_v50 = vunpack.i.l.bf16 %v1300_v45  ;;  %v1311_v45 = vunpack.i.l.bf16 %v1310_v58 }
  0x86   :  { %v1574_v36 = vpop.f32.mrf.mxu0  ;;  %v1315_v57 = vpop.permute.xlu0 %1314 }
  0x87   :  { %v90_v38 = vadd.f32 %v88_v35, %v1574_v36  ;;  %v1317_v61 = vunpack.i.h.bf16 %v1315_v57  ;;  %v1316_v0 = vunpack.i.l.bf16 %v1315_v57 }
  0x89   :  { %v99_v42 = vpack.c.bf16 %v90_v38, %v90_v38 }
  0x8b   :  { %v103_v46 = vunpack.c.l.b16 %v99_v42  ;;  %v1606_v42 = vpack.i.bf16 %v1597_v30, %v1595_v23 }
  0x8e   :  { %v1577_v41 = vpop.f32.mrf.mxu0 }
  0x8f   :  { %v91_v43 = vadd.f32 %v88_v35, %v1577_v41 }
  0x91   :  { %v100_v44 = vpack.c.bf16 %v91_v43, %v91_v43 }
  0x93   :  { %v104_v47 = vunpack.c.l.b16 %v100_v44  ;;  %v1312_v44 = vunpack.i.h.bf16 %v1310_v58 }
  0x95   :  { %v105_v48 = vpack.c.b16 %v104_v47, %v103_v46  ;;  %v1322_v46 = vunpack.i.h.bf16 %v1320_v40  ;;  %v1321_v47 = vunpack.i.l.bf16 %v1320_v40 }
  0x97   :  { %v1580_v55 = vunpack.c.l.bf16 %v105_v48  ;;  %v1582_v56 = vunpack.c.h.bf16 %v105_v48 }
  0x99   :  { %v199_v59 = vmul.f32 %v1301_v50, %v1580_v55  ;;  %v200_v60 = vmul.f32 %v1302_v49, %v1582_v56  ;;  %v203_v62 = vmul.f32 %v1291_v52, %v1580_v55  ;;  %v204_v63 = vmul.f32 %v1292_v51, %v1582_v56 }
  0x9a   :  { %v201_v1 = vmul.f32 %v1296_v54, %v1580_v55  ;;  %v202_v3 = vmul.f32 %v1297_v53, %v1582_v56  ;;  %v193_v35 = vmul.f32 %v1316_v0, %v1580_v55  ;;  %v194_v37 = vmul.f32 %v1317_v61, %v1582_v56 }
  0x9b   :  { %v210_v6 = vpack.c.bf16 %v200_v60, %v199_v59  ;;  %v212_v10 = vpack.c.bf16 %v204_v63, %v203_v62  ;;  %v197_v38 = vmul.f32 %v1306_v16, %v1580_v55  ;;  %v198_v39 = vmul.f32 %v1307_v11, %v1582_v56 }
  0x9c   :  { %v211_v20 = vpack.c.bf16 %v202_v3, %v201_v1  ;;  %v207_v43 = vpack.c.bf16 %v194_v37, %v193_v35  ;;  %v195_v49 = vmul.f32 %v1311_v45, %v1580_v55  ;;  %v196_v50 = vmul.f32 %v1312_v44, %v1582_v56 }
  0x9d   :  { %314 = vrot.lane.b32.xlu2 %v210_v6, %s1426_s16  ;;  %318 = vrot.lane.b32.xlu1 %v212_v10, %s1426_s16  ;;  %v209_v48 = vpack.c.bf16 %v198_v39, %v197_v38  ;;  %v191_v51 = vmul.f32 %v1321_v47, %v1580_v55  ;;  %v192_v52 = vmul.f32 %v1322_v46, %v1582_v56  ;;  %v92_v53 = vperm.slane %v1466_v2, 2 }
  0x9e   :  { %316 = vrot.lane.b32.xlu0 %v211_v20, %s1426_s16  ;;  %v208_v54 = vpack.c.bf16 %v196_v50, %v195_v49 }
  0x9f   :  { %v206_v57 = vpack.c.bf16 %v192_v52, %v191_v51 }
  0xa5   :  { %308 = vrot.lane.b32.xlu2 %v207_v43, %s1426_s16  ;;  %1324 = vrot.lane.b32.xlu1 %v1606_v42, %s1425_s7 }
  0xa6   :  { %312 = vrot.lane.b32.xlu0 %v209_v48, %s1426_s16 }
  0xad   :  { %94 = vrot.lane.b32.xlu2 %v92_v53, %s1427_s17  ;;  %310 = vrot.lane.b32.xlu1 %v208_v54, %s1426_s16 }
  0xae   :  { %306 = vrot.lane.b32.xlu0 %v206_v57, %s1426_s16 }
  0xb5   :  { %1339 = vrot.lane.b32.xlu2 %v1539_v26, %s1427_s17 }
  0xb6   :  { %1329 = vrot.lane.b32.xlu0 %v1525_v22, %s1427_s17 }
  0xbd   :  { %1354 = vrot.lane.b32.xlu2 %v1558_v31, %s1427_s17 }
  0xbe   :  { %1344 = vrot.lane.b32.xlu0 %v1521_v21, %s1427_s17 }
  0xc6   :  { %1359 = vrot.lane.b32.xlu0 %v1570_v34, %s1427_s17 }
  0xf7   :  { %v315_v58 = vpop.permute.xlu2 %314 }
  0xf8   :  { %v339_v20 = vsel %vm64_vm0, %v315_v58, 0 }
  0xff   :  { %v309_v59 = vpop.permute.xlu2 %308 }
 0x100   :  { %v330_v54 = vsel %vm64_vm0, %v309_v59, 0 }
 0x107   :  { %v95_v26 = vpop.permute.xlu2 %94 }
 0x108   :  { %v97_v3 = vadd.f32 %v95_v26, %v1574_v36  ;;  %v98_v21 = vadd.f32 %v95_v26, %v1577_v41 }
 0x10a   :  { %v213_v10 = vpack.c.bf16 %v97_v3, %v97_v3  ;;  %v214_v11 = vpack.c.bf16 %v98_v21, %v98_v21 }
 0x10c   :  { %v217_v35 = vunpack.c.l.b16 %v213_v10  ;;  %v218_v37 = vunpack.c.l.b16 %v214_v11 }
 0x10e   :  { %v219_v38 = vpack.c.b16 %v218_v37, %v217_v35 }
 0x10f   :  { %v319_v60 = vpop.permute.xlu1 %318  ;;  %v1340_v49 = vpop.permute.xlu2 %1339 }
 0x110   :  { %v317_v61 = vpop.permute.xlu0 %316  ;;  %v345_v62 = vsel %vm64_vm0, %v319_v60, 0  ;;  %v1641_v40 = vunpack.c.l.bf16 %v219_v38  ;;  %v1342_v50 = vunpack.i.h.bf16 %v1340_v49  ;;  %v1341_v51 = vunpack.i.l.bf16 %v1340_v49 }
 0x111   :  { %347 = vmatpush.bf16.xpose.msra.mxu1 %v345_v62  ;;  %v342_v31 = vsel %vm64_vm0, %v317_v61, 0 }
 0x112   :  { %v281_v53 = vmul.f32 %v1341_v51, %v1641_v40 }
 0x117   :  { %v1325_v63 = vpop.permute.xlu1 %1324 }
 0x118   :  { %v1327_v0 = vunpack.i.h.bf16 %v1325_v63  ;;  %v1326_v22 = vunpack.i.l.bf16 %v1325_v63  ;;  %v313_v1 = vpop.permute.xlu0 %312  ;;  %v1355_v63 = vpop.permute.xlu2 %1354 }
 0x119   :  { %348 = vmatpush.bf16.xpose.msra.mxu1 %v342_v31 }
 0x11a   :  { %v190_v34 = vmul.f32 %v1327_v0, %v1582_v56  ;;  %v189_v6 = vmul.f32 %v1326_v22, %v1580_v55  ;;  %v336_v56 = vsel %vm64_vm0, %v313_v1, 0  ;;  %v1643_v55 = vunpack.c.h.bf16 %v219_v38 }
 0x11b   :  { %v82_v22 = vperm.slane %v1466_v2, 0  ;;  %v1357_v38 = vunpack.i.h.bf16 %v1355_v63 }
 0x11c   :  { %v205_v9 = vpack.c.bf16 %v190_v34, %v189_v6  ;;  %v282_v52 = vmul.f32 %v1342_v50, %v1643_v55 }
 0x11d   :  { %v84_v31 = vadd.f32 %v82_v22, %v1577_v41  ;;  %v83_v3 = vadd.f32 %v82_v22, %v1574_v36 }
 0x11e   :  { %304 = vrot.lane.b32.xlu1 %v205_v9, %s1426_s16  ;;  %v292_v60 = vpack.c.bf16 %v282_v52, %v281_v53 }
 0x11f   :  { %v311_v47 = vpop.permute.xlu1 %310  ;;  %v295_v21 = vpack.c.bf16 %v84_v31, %v83_v3 }
 0x120   :  { %v307_v16 = vpop.permute.xlu0 %306 }
 0x121   :  { %349 = vmatpush.bf16.xpose.msra.mxu1 %v339_v20  ;;  %v327_v26 = vsel %vm64_vm0, %v307_v16, 0 }
 0x126   :  { %1334 = vrot.lane.b32.xlu1 %v1498_v12, %s1427_s17  ;;  %v333_v12 = vsel %vm64_vm0, %v311_v47, 0 }
 0x128   :  { %v1330_v39 = vpop.permute.xlu0 %1329 }
 0x129   :  { %v1332_v43 = vunpack.i.h.bf16 %v1330_v39  ;;  %v1331_v44 = vunpack.i.l.bf16 %v1330_v39  ;;  %350 = vmatpush.bf16.xpose.msra.mxu1 %v336_v56  ;;  %v1356_v39 = vunpack.i.l.bf16 %v1355_v63  ;;  %v1699_v63 = vld [vmem:[%s1933_s2 + $0xb8] sm:$0xff] }
 0x12b   :  { %v286_v45 = vmul.f32 %v1332_v43, %v1643_v55  ;;  %v285_v46 = vmul.f32 %v1331_v44, %v1641_v40  ;;  %v276_v43 = vmul.f32 %v1357_v38, %v1643_v55  ;;  %v275_v44 = vmul.f32 %v1356_v39, %v1641_v40 }
 0x12d   :  { %v294_v48 = vpack.c.bf16 %v286_v45, %v285_v46 }
 0x12e   :  { %1349 = vrot.lane.b32.xlu1 %v1549_v29, %s1427_s17 }
 0x12f   :  { %398 = vrot.lane.b32.xlu2 %v294_v48, %s1427_s17  ;;  %v289_v48 = vpack.c.bf16 %v276_v43, %v275_v44 }
 0x130   :  { %v1345_v57 = vpop.permute.xlu0 %1344 }
 0x131   :  { %351 = vmatpush.bf16.xpose.msra.mxu1 %v333_v12  ;;  %v1347_v29 = vunpack.i.h.bf16 %v1345_v57  ;;  %v1346_v58 = vunpack.i.l.bf16 %v1345_v57 }
 0x133   :  { %v280_v61 = vmul.f32 %v1347_v29, %v1643_v55  ;;  %v279_v62 = vmul.f32 %v1346_v58, %v1641_v40 }
 0x136   :  { %1364 = vrot.lane.b32.xlu1 %v1606_v42, %s1427_s17  ;;  %v291_v42 = vpack.c.bf16 %v280_v61, %v279_v62  ;;  %v1684_v62 = vld [vmem:[%s1933_s2 + $0xc8] sm:$0xff] }
 0x137   :  { %470 = vmatpush.bf16.msra.mxu3 %v1684_v62 }
 0x138   :  { %v1360_v45 = vpop.permute.xlu0 %1359 }
 0x139   :  { %352 = vmatpush.bf16.xpose.msra.mxu1 %v330_v54  ;;  %v1362_v46 = vunpack.i.h.bf16 %v1360_v45  ;;  %v1361_v47 = vunpack.i.l.bf16 %v1360_v45  ;;  %v1262_v45 = vld [vmem:[%s1933_s2 + $0x8] sm:$0xff] }
 0x13a   :  { %515 = vmatpush.bf16.msrb.mxu0 %v1262_v45 }
 0x13b   :  { %v274_v12 = vmul.f32 %v1362_v46, %v1643_v55  ;;  %v273_v49 = vmul.f32 %v1361_v47, %v1641_v40  ;;  %v1261_v46 = vld [vmem:[%s1933_s2] sm:$0xff] }
 0x13d   :  { %v288_v53 = vpack.c.bf16 %v274_v12, %v273_v49 }
 0x13e   :  { %394 = vrot.lane.b32.xlu1 %v292_v60, %s1427_s17  ;;  %516 = vmatpush.bf16.msrb.mxu0 %v1261_v46  ;;  %v1265_v46 = vld [vmem:[%s1933_s2 + $0x20] sm:$0xff] }
 0x141   :  { %353 = vmatpush.bf16.xpose.msra.mxu1 %v327_v26  ;;  %v25_v26 = vld [vmem:[%s1932_s1] sm:$0xff] }
 0x146   :  { %392 = vrot.lane.b32.xlu1 %v291_v42, %s1427_s17 }
 0x189   :  { %v399_v0 = vpop.permute.xlu2 %398 }
 0x18a   :  { %408 = vmatpush.bf16.msra.mxu2 %v399_v0 }
 0x190   :  { %v305_v59 = vpop.permute.xlu1 %304 }
 0x191   :  { %v324_v1 = vsel %vm64_vm0, %v305_v59, 0 }
 0x192   :  { %354 = vmatpush.bf16.xpose.msra.mxu1 %v324_v1  ;;  %v26_v1 = vld [vmem:[%s1932_s1 + $0x18] sm:$0xff] }
 0x198   :  { %v1335_v34 = vpop.permute.xlu1 %1334 }
 0x199   :  { %v1337_v6 = vunpack.i.h.bf16 %v1335_v34  ;;  %v1336_v9 = vunpack.i.l.bf16 %v1335_v34  ;;  %1131 = vmatmul.msk.bf16.vlgmr.msra.gmra.mxu1 %vm64_vm0, %v295_v21 }
 0x19b   :  { %v283_v10 = vmul.f32 %v1336_v9, %v1641_v40  ;;  %v284_v11 = vmul.f32 %v1337_v6, %v1643_v55  ;;  %v1708_v9 = vld [vmem:[%s1933_s2 + $0xb0] sm:$0xff] }
 0x19d   :  { %v293_v16 = vpack.c.bf16 %v284_v11, %v283_v10  ;;  %v1714_v10 = vld [vmem:[%s1933_s2 + $0xa8] sm:$0xff]  ;;  %v1720_v11 = vld [vmem:[%s1933_s2 + $0xa0] sm:$0xff] }
 0x19f   :  { %396 = vrot.lane.b32.xlu0 %v293_v16, %s1427_s17  ;;  %v1726_v16 = vld [vmem:[%s1933_s2 + $0x98] sm:$0xff] }
 0x1a0   :  { %v1350_v20 = vpop.permute.xlu1 %1349 }
 0x1a1   :  { %v1352_v35 = vunpack.i.h.bf16 %v1350_v20  ;;  %v1351_v37 = vunpack.i.l.bf16 %v1350_v20  ;;  %v1732_v20 = vld [vmem:[%s1933_s2 + $0x90] sm:$0xff] }
 0x1a3   :  { %v277_v41 = vmul.f32 %v1351_v37, %v1641_v40  ;;  %v278_v36 = vmul.f32 %v1352_v35, %v1643_v55 }
 0x1a5   :  { %v290_v56 = vpack.c.bf16 %v278_v36, %v277_v41 }
 0x1a7   :  { %390 = vrot.lane.b32.xlu1 %v290_v56, %s1427_s17 }
 0x1a8   :  { %v1365_v50 = vpop.permute.xlu1 %1364 }
 0x1a9   :  { %v1367_v51 = vunpack.i.h.bf16 %v1365_v50  ;;  %v1366_v52 = vunpack.i.l.bf16 %v1365_v50 }
 0x1ab   :  { %v271_v54 = vmul.f32 %v1366_v52, %v1641_v40  ;;  %v272_v57 = vmul.f32 %v1367_v51, %v1643_v55  ;;  %v1690_v40 = vld [vmem:[%s1933_s2 + $0xc0] sm:$0xff] }
 0x1ac   :  { %471 = vmatpush.bf16.msra.mxu3 %v1690_v40 }
 0x1ad   :  { %v287_v29 = vpack.c.bf16 %v272_v57, %v271_v54  ;;  %v493_v57 = vperm.slane %v1466_v2, 3 }
 0x1af   :  { %388 = vrot.lane.b32.xlu1 %v289_v48, %s1427_s17 }
 0x1b0   :  { %v395_v58 = vpop.permute.xlu1 %394  ;;  %472 = vmatpush.bf16.msra.mxu3 %v1699_v63 }
 0x1b4   :  { %473 = vmatpush.bf16.msra.mxu3 %v1708_v9 }
 0x1b7   :  { %386 = vrot.lane.b32.xlu1 %v288_v53, %s1427_s17 }
 0x1b8   :  { %v393_v60 = vpop.permute.xlu1 %392  ;;  %474 = vmatpush.bf16.msra.mxu3 %v1714_v10 }
 0x1bc   :  { %475 = vmatpush.bf16.msra.mxu3 %v1720_v11 }
 0x1bf   :  { %384 = vrot.lane.b32.xlu1 %v287_v29, %s1427_s17  ;;  %s1110_s17 = sshll.u32 %s1935_s4, 4  ;;  %s1111_s17 = int_to_ptr.hbm [resolvable:$true] %s1110_s17 }
 0x1c0   :  { %476 = vmatpush.bf16.msra.mxu3 %v1726_v16 }
 0x1c4   :  { %477 = vmatpush.bf16.msra.mxu3 %v1732_v20 }
 0x211   :  { %v397_v61 = vpop.permute.xlu0 %396 }
 0x212   :  { %409 = vmatpush.bf16.msra.mxu2 %v397_v61 }
 0x216   :  { %v356_v55 = vpop.f32.mrf.mxu1  ;;  %410 = vmatpush.bf16.msra.mxu2 %v395_v58 }
 0x217   :  { %v361_v42 = vmul.f32 0.5, %v356_v55 }
 0x219   :  { %v391_v0 = vpop.permute.xlu1 %390  ;;  %v363_v59 = vadd.f32 %v361_v42, %v25_v26 }
 0x21a   :  { %411 = vmatpush.bf16.msra.mxu2 %v393_v60 }
 0x21b   :  { %365 = vmax.xlane.f32.xlu2 %v363_v59 }
 0x21e   :  { %v358_v22 = vpop.f32.mrf.mxu1  ;;  %412 = vmatpush.bf16.msra.mxu2 %v391_v0 }
 0x21f   :  { %v362_v31 = vmul.f32 0.5, %v358_v22 }
 0x221   :  { %v389_v3 = vpop.permute.xlu1 %388  ;;  %v364_v21 = vadd.f32 %v362_v31, %v26_v1 }
 0x222   :  { %413 = vmatpush.bf16.msra.mxu2 %v389_v3 }
 0x223   :  { %367 = vmax.xlane.f32.xlu0 %v364_v21 }
 0x229   :  { %v387_v34 = vpop.permute.xlu1 %386 }
 0x22a   :  { %414 = vmatpush.bf16.msra.mxu2 %v387_v34 }
 0x231   :  { %v385_v6 = vpop.permute.xlu1 %384 }
 0x232   :  { %415 = vmatpush.bf16.msra.mxu2 %v385_v6 }
 0x28e   :  { %v366_v35 = vpop.xlane.xlu2 %365 }
 0x28f   :  { %v369_v37 = vsub.f32 %v363_v59, %v366_v35  ;;  %v1428_v59 = vmov 32.0  }
 0x291   :  { %v371_v41 = vmul.f32 1.442695, %v369_v37 }
 0x293   :  { %1368 = vpow2.f32 %v371_v41 }
 0x296   :  { %v368_v36 = vpop.xlane.xlu0 %367 }
 0x297   :  { %v370_v38 = vsub.f32 %v364_v21, %v368_v36 }
 0x299   :  { %v373_v39 = vmul.f32 1.442695, %v370_v38  ;;  %v1369_v56 = vpop.eup %1368 }
 0x29b   :  { %1370 = vpow2.f32 %v373_v39 }
 0x2a1   :  { %v1371_v43 = vpop.eup %1370 }
 0x2a2   :  { %v375_v44 = vpack.c.bf16 %v1371_v43, %v1369_v56  ;;  %v1266_v43 = vld [vmem:[%s1933_s2 + $0x28] sm:$0xff] }
 0x2a3   :  { %644 = vmatpush.bf16.msrb.mxu3 %v1266_v43 }
 0x2a4   :  { %416 = vmatmul.bf16.vlgmr.msra.gmra.mxu2 %v375_v44  ;;  %478 = vmatmul.bf16.vlgmr.msra.gmra.mxu3 %v375_v44 }
 0x2a7   :  { %645 = vmatpush.bf16.msrb.mxu3 %v1265_v46 }
 0x327   :  { %v479_v47 = vpop.f32.mrf.mxu3  ;;  %v417_v48 = vpop.f32.mrf.mxu2 }
 0x328   :  { %1372 = vrcp.f32 %v479_v47 }
 0x32e   :  { %v1373_v49 = vpop.eup %1372 }
 0x32f   :  { %v481_v12 = vpop.f32.mrf.mxu3  ;;  %v419_v51 = vpop.f32.mrf.mxu2  ;;  %v486_v52 = vmul.f32 %v1373_v49, %v417_v48  ;;  %v1264_v48 = vld [vmem:[%s1933_s2 + $0x18] sm:$0xff] }
 0x330   :  { %1374 = vrcp.f32 %v481_v12  ;;  %609 = vmatpush.bf16.msra.mxu0 %v1264_v48 }
 0x331   :  { %1376 = vrcp.f32 %v1428_v59 }
 0x336   :  { %v1375_v50 = vpop.eup %1374 }
 0x337   :  { %v487_v53 = vmul.f32 %v1375_v50, %v419_v51  ;;  %v1377_v22 = vpop.eup %1376  ;;  %v1263_v50 = vld [vmem:[%s1933_s2 + $0x10] sm:$0xff] }
 0x338   :  { %v532_v1 = vmul.f32 32.0, %v1377_v22  ;;  %vm536_vm1 = vweird.f32 %v1377_v22  ;;  %v21_v51 = vld [vmem:[%s1931_s0 + $0x10] sm:$0xff]  ;;  %610 = vmatpush.bf16.msra.mxu0 %v1263_v50 }
 0x339   :  { %v488_v54 = vpack.c.bf16 %v487_v53, %v486_v52  ;;  %v22_v52 = vld [vmem:[%s1931_s0 + $0x18] sm:$0xff] }
 0x33a   :  { %v533_v31 = vsub.f32 1.0, %v532_v1  ;;  %v1777_v1 = vld [vmem:[%s1932_s1 + $0x28] sm:$0xff] }
 0x33b   :  { %1172 = vmatmul.msk.bf16.vlgmr.msrb.gmra.mxu0 %vm64_vm0, %v488_v54 }
 0x33c   :  { %v534_v3 = vmul.f32 %v1377_v22, %v533_v31 }
 0x33e   :  { %v535_v21 = vadd.f32 %v1377_v22, %v534_v3 }
 0x340   :  { %v1747_v34 = vsel %vm536_vm1, %v1377_v22, %v535_v21  ;;  %v576_v21 = vperm.slane %v1777_v1, 0 }
 0x3b8   :  { %v518_v29 = vpop.f32.mrf.mxu0 }
 0x3b9   :  { %v519_v58 = vadd.f32 %v518_v29, %v493_v57  ;;  %v582_v29 = vpack.c.bf16 %v22_v52, %v21_v51 }
 0x3bb   :  { %v523_v60 = vadd.f32 %v519_v58, %v1474_v4  ;;  %1181 = vmatmul.msk.bf16.vlgmr.msra.gmra.mxu0 %vm64_vm0, %v582_v29 }
 0x3bd   :  { %v525_v61 = vsel %vm64_vm0, %v523_v60, 0.0 }
 0x3be   :  { %526 = vadd.xlane.f32.xlu2 %v525_v61 }
 0x3c0   :  { %v520_v55 = vpop.f32.mrf.mxu0 }
 0x3c1   :  { %v521_v26 = vadd.f32 %v520_v55, %v493_v57 }
 0x3c3   :  { %v524_v42 = vadd.f32 %v521_v26, %v1479_v5 }
 0x3c5   :  { %v528_v0 = vsel %vm64_vm0, %v524_v42, 0.0 }
 0x3c6   :  { %529 = vadd.xlane.f32.xlu1 %v528_v0 }
 0x431   :  { %v527_v4 = vpop.xlane.xlu2 %526 }
 0x432   :  { %v538_v6 = vmul.f32 %v1747_v34, %v527_v4 }
 0x434   :  { %v540_v35 = vsub.f32 %v523_v60, %v538_v6 }
 0x436   :  { %v542_v37 = vmul.f32 %v540_v35, %v540_v35 }
 0x438   :  { %v544_v5 = vsel %vm64_vm0, %v542_v37, 0.0 }
 0x439   :  { %v530_v41 = vpop.xlane.xlu1 %529  ;;  %545 = vadd.xlane.f32.xlu2 %v544_v5 }
 0x43a   :  { %v539_v36 = vmul.f32 %v1747_v34, %v530_v41  ;;  %v579_v41 = vperm.slane %v1777_v1, 1 }
 0x43c   :  { %v541_v38 = vsub.f32 %v524_v42, %v539_v36 }
 0x43e   :  { %v543_v39 = vmul.f32 %v541_v38, %v541_v38 }
 0x440   :  { %v547_v56 = vsel %vm64_vm0, %v543_v39, 0.0 }
 0x441   :  { %548 = vadd.xlane.f32.xlu0 %v547_v56 }
 0x4ac   :  { %v546_v44 = vpop.xlane.xlu2 %545 }
 0x4ad   :  { %v550_v45 = vmul.f32 %v546_v44, %v1747_v34  ;;  %v622_v44 = vperm.slane %v1466_v2, 5 }
 0x4af   :  { %v552_v47 = vadd.f32 1e-05, %v550_v45 }
 0x4b1   :  { %1378 = vrsqrt.f32 %v552_v47  ;;  %vm560_vm3 = vweird.f32 %v552_v47 }
 0x4b4   :  { %v549_v12 = vpop.xlane.xlu0 %548 }
 0x4b5   :  { %v551_v49 = vmul.f32 %v549_v12, %v1747_v34 }
 0x4b7   :  { %v1379_v53 = vpop.eup %1378  ;;  %v553_v54 = vadd.f32 1e-05, %v551_v49 }
 0x4b8   :  { %v555_v57 = vmul.f32 %v1379_v53, %v552_v47  ;;  %vm561_vm2 = vweird.f32 %v1379_v53 }
 0x4b9   :  { %1380 = vrsqrt.f32 %v553_v54  ;;  %vm562_vm4 = vmor %vm560_vm3, %vm561_vm2  ;;  %vm570_vm6 = vweird.f32 %v553_v54 }
 0x4ba   :  { %v556_v58 = vmul.f32 %v1379_v53, %v555_v57 }
 0x4bc   :  { %v557_v60 = vmul.f32 0.5, %v556_v58 }
 0x4be   :  { %v558_v61 = vsub.f32 1.5, %v557_v60 }
 0x4bf   :  { %v1381_v55 = vpop.eup %1380 }
 0x4c0   :  { %v559_v26 = vmul.f32 %v1379_v53, %v558_v61  ;;  %v565_v42 = vmul.f32 %v1381_v55, %v553_v54  ;;  %vm571_vm5 = vweird.f32 %v1381_v55 }
 0x4c1   :  { %vm572_vm7 = vmor %vm570_vm6, %vm571_vm5 }
 0x4c2   :  { %v566_v0 = vmul.f32 %v1381_v55, %v565_v42  ;;  %v563_v59 = vsel %vm562_vm4, %v1379_v53, %v559_v26 }
 0x4c3   :  { %v574_v3 = vmul.f32 %v563_v59, %v540_v35 }
 0x4c4   :  { %v567_v22 = vmul.f32 0.5, %v566_v0 }
 0x4c5   :  { %v577_v5 = vmul.f32 %v576_v21, %v574_v3 }
 0x4c6   :  { %v568_v31 = vsub.f32 1.5, %v567_v22 }
 0x4c7   :  { %v1781_v39 = vadd.f32 %v579_v41, %v577_v5 }
 0x4c8   :  { %v569_v4 = vmul.f32 %v1381_v55, %v568_v31 }
 0x4ca   :  { %v573_v6 = vsel %vm572_vm7, %v1381_v55, %v569_v4 }
 0x4cb   :  { %v575_v37 = vmul.f32 %v573_v6, %v541_v38 }
 0x4cd   :  { %v578_v36 = vmul.f32 %v576_v21, %v575_v37 }
 0x4cf   :  { %v1783_v56 = vadd.f32 %v579_v41, %v578_v36 }
 0x4d1   :  { %v617_v43 = vpack.c.bf16 %v1783_v56, %v1781_v39 }
 0x4d3   :  { %1190 = vmatmul.msk.bf16.vlgmr.msrb.gmra.mxu3 %vm64_vm0, %v617_v43  ;;  %v1268_v43 = vld [vmem:[%s1933_s2 + $0x38] sm:$0xff] }
 0x4d4   :  { %679 = vmatpush.bf16.msra.mxu3 %v1268_v43 }
 0x556   :  { %v647_v35 = vpop.f32.mrf.mxu3 }
 0x557   :  { %v648_v45 = vadd.f32 %v647_v35, %v622_v44  ;;  %v1267_v35 = vld [vmem:[%s1933_s2 + $0x30] sm:$0xff] }
 0x558   :  { %680 = vmatpush.bf16.msra.mxu3 %v1267_v35 }
 0x559   :  { %v687_v47 = vpack.c.bf16 %v648_v45, %v648_v45  ;;  %v24_v45 = vld [vmem:[%s1931_s0 + $0x28] sm:$0xff] }
 0x55b   :  { %v691_v12 = vunpack.c.l.b16 %v687_v47 }
 0x55c   :  { %826 = vmatpush.bf16.msrb.mxu3 %v1684_v62 }
 0x55e   :  { %v649_v46 = vpop.f32.mrf.mxu3 }
 0x55f   :  { %v650_v38 = vadd.f32 %v649_v46, %v622_v44  ;;  %v23_v44 = vld [vmem:[%s1931_s0 + $0x20] sm:$0xff] }
 0x560   :  { %v652_v47 = vpack.c.bf16 %v24_v45, %v23_v44  ;;  %827 = vmatpush.bf16.msrb.mxu3 %v1690_v40 }
 0x561   :  { %v688_v48 = vpack.c.bf16 %v650_v38, %v650_v38 }
 0x562   :  { %1199 = vmatmul.msk.bf16.vlgmr.msra.gmra.mxu3 %vm64_vm0, %v652_v47 }
 0x563   :  { %v692_v49 = vunpack.c.l.b16 %v688_v48 }
 0x564   :  { %828 = vmatpush.bf16.msrb.mxu3 %v1699_v63 }
 0x565   :  { %v693_v50 = vpack.c.b16 %v692_v49, %v691_v12 }
 0x567   :  { %v695_v51 = vunpack.c.l.bf16 %v693_v50  ;;  %v696_v52 = vunpack.c.h.bf16 %v693_v50  ;;  %v612_v50 = vpop.f32.mrf.mxu0 }
 0x568   :  { %829 = vmatpush.bf16.msrb.mxu3 %v1708_v9  ;;  %v657_v9 = vperm.slane %v1466_v2, 6 }
 0x569   :  { %v711_v53 = vmul.f32 %v695_v51, %v1500_v13  ;;  %v712_v54 = vmul.f32 %v696_v52, %v1502_v14  ;;  %v709_v58 = vmul.f32 %v695_v51, %v1482_v7  ;;  %v710_v60 = vmul.f32 %v696_v52, %v1484_v8 }
 0x56a   :  { %v707_v26 = vmul.f32 %v695_v51, %v1512_v18  ;;  %v708_v42 = vmul.f32 %v696_v52, %v1514_v19  ;;  %v705_v22 = vmul.f32 %v695_v51, %v1504_v15  ;;  %v706_v31 = vmul.f32 %v696_v52, %v1508_v17 }
 0x56b   :  { %v720_v57 = vpack.c.bf16 %v712_v54, %v711_v53  ;;  %v719_v61 = vpack.c.bf16 %v710_v60, %v709_v58  ;;  %v703_v4 = vmul.f32 %v695_v51, %v1533_v24  ;;  %v704_v6 = vmul.f32 %v696_v52, %v1535_v25 }
 0x56c   :  { %v718_v0 = vpack.c.bf16 %v708_v42, %v707_v26  ;;  %v717_v3 = vpack.c.bf16 %v706_v31, %v705_v22  ;;  %v701_v41 = vmul.f32 %v695_v51, %v1543_v27  ;;  %v702_v36 = vmul.f32 %v696_v52, %v1545_v28  ;;  %830 = vmatpush.bf16.msrb.mxu3 %v1714_v10 }
 0x56d   :  { %v781_v29 = vsel %vm64_vm0, %v720_v57, 0  ;;  %v778_v55 = vsel %vm64_vm0, %v719_v61, 0  ;;  %v716_v37 = vpack.c.bf16 %v704_v6, %v703_v4  ;;  %v699_v48 = vmul.f32 %v695_v51, %v1562_v32 }
 0x56e   :  { %783 = vmatpush.bf16.xpose.msrb.mxu0 %v781_v29  ;;  %v775_v59 = vsel %vm64_vm0, %v718_v0, 0  ;;  %v772_v21 = vsel %vm64_vm0, %v717_v3, 0  ;;  %v715_v46 = vpack.c.bf16 %v702_v36, %v701_v41  ;;  %v700_v12 = vmul.f32 %v696_v52, %v1564_v33 }
 0x56f   :  { %v769_v5 = vsel %vm64_vm0, %v716_v37, 0  ;;  %v697_v54 = vmul.f32 %v695_v51, %v1595_v23  ;;  %v698_v62 = vmul.f32 %v696_v52, %v1597_v30  ;;  %v587_v29 = vperm.slane %v1466_v2, 4  ;;  %v614_v58 = vpop.f32.mrf.mxu0 }
 0x570   :  { %v766_v38 = vsel %vm64_vm0, %v715_v46, 0  ;;  %v714_v49 = vpack.c.bf16 %v700_v12, %v699_v48  ;;  %831 = vmatpush.bf16.msrb.mxu3 %v1720_v11  ;;  %v27_v11 = vld [vmem:[%s1932_s1 + $0x8] sm:$0xff] }
 0x571   :  { %v713_v57 = vpack.c.bf16 %v698_v62, %v697_v54  ;;  %v613_v60 = vadd.f32 %v612_v50, %v587_v29  ;;  %v615_v63 = vadd.f32 %v614_v58, %v587_v29 }
 0x572   :  { %v763_v53 = vsel %vm64_vm0, %v714_v49, 0 }
 0x573   :  { %v760_v40 = vsel %vm64_vm0, %v713_v57, 0  ;;  %v755_v61 = vpack.c.bf16 %v615_v63, %v613_v60 }
 0x574   :  { %832 = vmatpush.bf16.msrb.mxu3 %v1726_v16 }
 0x576   :  { %784 = vmatpush.bf16.xpose.msrb.mxu0 %v778_v55 }
 0x578   :  { %833 = vmatpush.bf16.msrb.mxu3 %v1732_v20 }
 0x57e   :  { %785 = vmatpush.bf16.xpose.msrb.mxu0 %v775_v59 }
 0x586   :  { %786 = vmatpush.bf16.xpose.msrb.mxu0 %v772_v21 }
 0x58e   :  { %787 = vmatpush.bf16.xpose.msrb.mxu0 %v769_v5 }
 0x596   :  { %788 = vmatpush.bf16.xpose.msrb.mxu0 %v766_v38 }
 0x59e   :  { %789 = vmatpush.bf16.xpose.msrb.mxu0 %v763_v53 }
 0x5a6   :  { %790 = vmatpush.bf16.xpose.msrb.mxu0 %v760_v40 }
 0x5ad   :  { %1200 = vmatmul.msk.bf16.vlgmr.msrb.gmra.mxu0 %vm64_vm0, %v755_v61 }
 0x5e5   :  { %v682_v51 = vpop.f32.mrf.mxu3 }
 0x5e6   :  { %v683_v52 = vadd.f32 %v682_v51, %v657_v9 }
 0x5e8   :  { %v721_v55 = vpack.c.bf16 %v683_v52, %v683_v52 }
 0x5ea   :  { %v725_v42 = vunpack.c.l.b16 %v721_v55 }
 0x5ed   :  { %v684_v10 = vpop.f32.mrf.mxu3 }
 0x5ee   :  { %v685_v26 = vadd.f32 %v684_v10, %v657_v9  ;;  %v1398_v10 = vld [vmem:[%s1932_s1 + $0x10] sm:$0xff] }
 0x5f0   :  { %v722_v0 = vpack.c.bf16 %v685_v26, %v685_v26  ;;  %v849_v26 = vperm.slane %v1398_v10, 7 }
 0x5f2   :  { %v726_v59 = vunpack.c.l.b16 %v722_v0 }
 0x5f4   :  { %v727_v22 = vpack.c.b16 %v726_v59, %v725_v42 }
 0x5f6   :  { %v729_v16 = vunpack.c.l.bf16 %v727_v22  ;;  %v730_v3 = vunpack.c.h.bf16 %v727_v22 }
 0x5f8   :  { %v745_v20 = vmul.f32 %v729_v16, %v1500_v13  ;;  %v746_v2 = vmul.f32 %v730_v3, %v1502_v14  ;;  %v743_v4 = vmul.f32 %v729_v16, %v1482_v7  ;;  %v744_v6 = vmul.f32 %v730_v3, %v1484_v8  ;;  %v28_v13 = vld [vmem:[%s1932_s1 + $0x20] sm:$0xff] }
 0x5f9   :  { %v741_v36 = vmul.f32 %v729_v16, %v1512_v18  ;;  %v742_v43 = vmul.f32 %v730_v3, %v1514_v19  ;;  %v739_v7 = vmul.f32 %v729_v16, %v1504_v15  ;;  %v740_v8 = vmul.f32 %v730_v3, %v1508_v17 }
 0x5fa   :  { %v754_v5 = vpack.c.bf16 %v746_v2, %v745_v20  ;;  %v753_v41 = vpack.c.bf16 %v744_v6, %v743_v4  ;;  %v737_v18 = vmul.f32 %v729_v16, %v1533_v24  ;;  %v738_v19 = vmul.f32 %v730_v3, %v1535_v25 }
 0x5fb   :  { %v752_v14 = vpack.c.bf16 %v742_v43, %v741_v36  ;;  %v751_v46 = vpack.c.bf16 %v740_v8, %v739_v7  ;;  %v735_v38 = vmul.f32 %v729_v16, %v1543_v27  ;;  %v736_v48 = vmul.f32 %v730_v3, %v1545_v28 }
 0x5fc   :  { %812 = vmatpush.bf16.msrb.mxu2 %v754_v5  ;;  %v750_v47 = vpack.c.bf16 %v738_v19, %v737_v18  ;;  %v733_v15 = vmul.f32 %v729_v16, %v1562_v32  ;;  %v734_v17 = vmul.f32 %v730_v3, %v1564_v33  ;;  %v731_v50 = vmul.f32 %v729_v16, %v1595_v23  ;;  %v1270_v23 = vld [vmem:[%s1933_s2 + $0x48] sm:$0xff] }
 0x5fd   :  { %v749_v12 = vpack.c.bf16 %v736_v48, %v735_v38  ;;  %v732_v24 = vmul.f32 %v730_v3, %v1597_v30  ;;  %871 = vmatpush.bf16.msrb.mxu1 %v1270_v23  ;;  %v1269_v30 = vld [vmem:[%s1933_s2 + $0x40] sm:$0xff] }
 0x5fe   :  { %v748_v49 = vpack.c.bf16 %v734_v17, %v733_v15 }
 0x5ff   :  { %v747_v25 = vpack.c.bf16 %v732_v24, %v731_v50 }
 0x600   :  { %813 = vmatpush.bf16.msrb.mxu2 %v753_v41 }
 0x601   :  { %872 = vmatpush.bf16.msrb.mxu1 %v1269_v30 }
 0x604   :  { %814 = vmatpush.bf16.msrb.mxu2 %v752_v14  ;;  %v1280_v14 = vld [vmem:[%s1933_s2 + $0x88] sm:$0xff] }
 0x608   :  { %815 = vmatpush.bf16.msrb.mxu2 %v751_v46 }
 0x60c   :  { %816 = vmatpush.bf16.msrb.mxu2 %v750_v47  ;;  %v1278_v47 = vld [vmem:[%s1933_s2 + $0x78] sm:$0xff] }
 0x610   :  { %817 = vmatpush.bf16.msrb.mxu2 %v749_v12  ;;  %v1277_v12 = vld [vmem:[%s1933_s2 + $0x70] sm:$0xff] }
 0x614   :  { %818 = vmatpush.bf16.msrb.mxu2 %v748_v49 }
 0x618   :  { %819 = vmatpush.bf16.msrb.mxu2 %v747_v25 }
 0x61c   :  { %1036 = vmatpush.bf16.msra.mxu2 %v1280_v14 }
 0x62a   :  { %v792_v31 = vpop.f32.mrf.mxu0 }
 0x62b   :  { %v797_v21 = vmul.f32 0.5, %v792_v31 }
 0x62d   :  { %v799_v37 = vadd.f32 %v797_v21, %v27_v11 }
 0x62f   :  { %801 = vmax.xlane.f32.xlu2 %v799_v37 }
 0x632   :  { %v794_v35 = vpop.f32.mrf.mxu0 }
 0x633   :  { %v798_v44 = vmul.f32 0.5, %v794_v35 }
 0x635   :  { %v800_v45 = vadd.f32 %v798_v44, %v28_v13  ;;  %v1272_v13 = vld [vmem:[%s1934_s3 + $0x18] sm:$0xff]  ;;  %v1271_v44 = vld [vmem:[%s1934_s3 + $0x10] sm:$0xff] }
 0x636   :  { %960 = vmatpush.bf16.msra.mxu1 %v1272_v13 }
 0x637   :  { %803 = vmax.xlane.f32.xlu0 %v800_v45 }
 0x63a   :  { %961 = vmatpush.bf16.msra.mxu1 %v1271_v44 }
 0x6a2   :  { %v802_v53 = vpop.xlane.xlu2 %801 }
 0x6a3   :  { %v805_v54 = vsub.f32 %v799_v37, %v802_v53 }
 0x6a5   :  { %v807_v27 = vmul.f32 1.442695, %v805_v54 }
 0x6a7   :  { %1382 = vpow2.f32 %v807_v27  ;;  %v925_v27 = vperm.slane %v1777_v1, 2 }
 0x6aa   :  { %v804_v62 = vpop.xlane.xlu0 %803 }
 0x6ab   :  { %v806_v28 = vsub.f32 %v800_v45, %v804_v62  ;;  %v1279_v45 = vld [vmem:[%s1933_s2 + $0x80] sm:$0xff] }
 0x6ac   :  { %1037 = vmatpush.bf16.msra.mxu2 %v1279_v45 }
 0x6ad   :  { %v809_v57 = vmul.f32 1.442695, %v806_v28  ;;  %v1383_v32 = vpop.eup %1382 }
 0x6af   :  { %1384 = vpow2.f32 %v809_v57 }
 0x6b0   :  { %1038 = vmatpush.bf16.msra.mxu2 %v1278_v47 }
 0x6b4   :  { %1039 = vmatpush.bf16.msra.mxu2 %v1277_v12 }
 0x6b5   :  { %v1385_v29 = vpop.eup %1384 }
 0x6b6   :  { %v811_v33 = vpack.c.bf16 %v1385_v29, %v1383_v32  ;;  %v928_v32 = vperm.slane %v1777_v1, 3 }
 0x6b8   :  { %820 = vmatmul.bf16.vlgmr.msrb.gmra.mxu2 %v811_v33  ;;  %834 = vmatmul.bf16.vlgmr.msrb.gmra.mxu3 %v811_v33 }
 0x73b   :  { %v835_v58 = vpop.f32.mrf.mxu3  ;;  %v821_v40 = vpop.f32.mrf.mxu2 }
 0x73c   :  { %1386 = vrcp.f32 %v835_v58 }
 0x742   :  { %v1387_v63 = vpop.eup %1386 }
 0x743   :  { %v837_v60 = vpop.f32.mrf.mxu3  ;;  %v823_v9 = vpop.f32.mrf.mxu2  ;;  %v842_v51 = vmul.f32 %v1387_v63, %v821_v40  ;;  %v1275_v63 = vld [vmem:[%s1933_s2 + $0x60] sm:$0xff] }
 0x744   :  { %1388 = vrcp.f32 %v837_v60  ;;  %v1276_v60 = vld [vmem:[%s1933_s2 + $0x68] sm:$0xff] }
 0x745   :  { %1040 = vmatpush.bf16.msra.mxu2 %v1276_v60 }
 0x749   :  { %1041 = vmatpush.bf16.msra.mxu2 %v1275_v63 }
 0x74a   :  { %v1389_v61 = vpop.eup %1388 }
 0x74b   :  { %v843_v52 = vmul.f32 %v1389_v61, %v823_v9  ;;  %v1274_v61 = vld [vmem:[%s1933_s2 + $0x58] sm:$0xff]  ;;  %v1273_v9 = vld [vmem:[%s1933_s2 + $0x50] sm:$0xff]  ;;  %s1429_s2 = smov [#allocation2]  }
 0x74d   :  { %v844_v55 = vpack.c.bf16 %v843_v52, %v842_v51  ;;  %1042 = vmatpush.bf16.msra.mxu2 %v1274_v61  ;;  %v936_v51 = vld [vmem:[%s1934_s3 + $0x20] sm:$0x1]  ;;  %s1108_s3 = sshll.u32 %s1429_s2, 4  ;;  %s1109_s3 = int_to_ptr.vmem [resolvable:$true] %s1108_s3 }
 0x74e   :  { %v937_v52 = vunpack.c.l.bf16 %v936_v51 }
 0x74f   :  { %1209 = vmatmul.msk.bf16.vlgmr.msrb.gmra.mxu1 %vm64_vm0, %v844_v55 }
 0x750   :  { %v938_v10 = vperm.slane %v937_v52, 0 }
 0x751   :  { %1043 = vmatpush.bf16.msra.mxu2 %v1273_v9 }
 0x7cc   :  { %v874_v42 = vpop.f32.mrf.mxu1 }
 0x7cd   :  { %v875_v0 = vadd.f32 %v874_v42, %v849_v26 }
 0x7cf   :  { %v879_v59 = vadd.f32 %v875_v0, %v1781_v39 }
 0x7d1   :  { %v881_v22 = vsel %vm64_vm0, %v879_v59, 0.0 }
 0x7d2   :  { %882 = vadd.xlane.f32.xlu2 %v881_v22 }
 0x7d4   :  { %v876_v31 = vpop.f32.mrf.mxu1 }
 0x7d5   :  { %v877_v11 = vadd.f32 %v876_v31, %v849_v26 }
 0x7d7   :  { %v880_v16 = vadd.f32 %v877_v11, %v1783_v56  ;;  %v987_v11 = vperm.slane %v1777_v1, 6 }
 0x7d9   :  { %v884_v3 = vsel %vm64_vm0, %v880_v16, 0.0 }
 0x7da   :  { %885 = vadd.xlane.f32.xlu0 %v884_v3 }
 0x845   :  { %v883_v21 = vpop.xlane.xlu2 %882 }
 0x846   :  { %v887_v20 = vmul.f32 %v883_v21, %v1747_v34 }
 0x848   :  { %v889_v2 = vsub.f32 %v879_v59, %v887_v20 }
 0x84a   :  { %v891_v4 = vmul.f32 %v889_v2, %v889_v2 }
 0x84c   :  { %v893_v6 = vsel %vm64_vm0, %v891_v4, 0.0 }
 0x84d   :  { %v886_v37 = vpop.xlane.xlu0 %885  ;;  %894 = vadd.xlane.f32.xlu2 %v893_v6 }
 0x84e   :  { %v888_v39 = vmul.f32 %v886_v37, %v1747_v34 }
 0x850   :  { %v890_v5 = vsub.f32 %v880_v16, %v888_v39 }
 0x852   :  { %v892_v41 = vmul.f32 %v890_v5, %v890_v5 }
 0x854   :  { %v896_v36 = vsel %vm64_vm0, %v892_v41, 0.0 }
 0x855   :  { %897 = vadd.xlane.f32.xlu0 %v896_v36 }
 0x8c0   :  { %v895_v56 = vpop.xlane.xlu2 %894 }
 0x8c1   :  { %v899_v43 = vmul.f32 %v895_v56, %v1747_v34 }
 0x8c3   :  { %v901_v35 = vadd.f32 1e-05, %v899_v43 }
 0x8c5   :  { %1390 = vrsqrt.f32 %v901_v35  ;;  %vm909_vm9 = vweird.f32 %v901_v35 }
 0x8c8   :  { %v898_v7 = vpop.xlane.xlu0 %897 }
 0x8c9   :  { %v900_v8 = vmul.f32 %v898_v7, %v1747_v34 }
 0x8cb   :  { %v1391_v46 = vpop.eup %1390  ;;  %v902_v18 = vadd.f32 1e-05, %v900_v8 }
 0x8cc   :  { %v904_v19 = vmul.f32 %v1391_v46, %v901_v35  ;;  %vm910_vm8 = vweird.f32 %v1391_v46 }
 0x8cd   :  { %1392 = vrsqrt.f32 %v902_v18  ;;  %vm911_vm10 = vmor %vm909_vm9, %vm910_vm8  ;;  %vm919_vm12 = vweird.f32 %v902_v18 }
 0x8ce   :  { %v905_v38 = vmul.f32 %v1391_v46, %v904_v19 }
 0x8d0   :  { %v906_v48 = vmul.f32 0.5, %v905_v38 }
 0x8d2   :  { %v907_v15 = vsub.f32 1.5, %v906_v48 }
 0x8d3   :  { %v1393_v17 = vpop.eup %1392 }
 0x8d4   :  { %v908_v49 = vmul.f32 %v1391_v46, %v907_v15  ;;  %v914_v50 = vmul.f32 %v1393_v17, %v902_v18  ;;  %vm920_vm11 = vweird.f32 %v1393_v17 }
 0x8d5   :  { %vm921_vm13 = vmor %vm919_vm12, %vm920_vm11 }
 0x8d6   :  { %v915_v24 = vmul.f32 %v1393_v17, %v914_v50  ;;  %v912_v25 = vsel %vm911_vm10, %v1391_v46, %v908_v49 }
 0x8d7   :  { %v923_v62 = vmul.f32 %v912_v25, %v889_v2 }
 0x8d8   :  { %v916_v53 = vmul.f32 0.5, %v915_v24  ;;  %v1096_v24 = vperm.slane %v1777_v1, 4 }
 0x8d9   :  { %v926_v29 = vmul.f32 %v925_v27, %v923_v62 }
 0x8da   :  { %v917_v54 = vsub.f32 1.5, %v916_v53 }
 0x8db   :  { %v929_v30 = vadd.f32 %v928_v32, %v926_v29 }
 0x8dc   :  { %v918_v28 = vmul.f32 %v1393_v17, %v917_v54 }
 0x8de   :  { %v922_v57 = vsel %vm921_vm13, %v1393_v17, %v918_v28 }
 0x8df   :  { %v924_v33 = vmul.f32 %v922_v57, %v890_v5 }
 0x8e1   :  { %v927_v23 = vmul.f32 %v925_v27, %v924_v33 }
 0x8e3   :  { %v930_v58 = vadd.f32 %v928_v32, %v927_v23 }
 0x8e5   :  { %v931_v40 = vpack.c.bf16 %v930_v58, %v929_v30 }
 0x8e7   :  { %1218 = vmatmul.msk.bf16.vlgmr.msra.gmra.mxu1 %vm64_vm0, %v931_v40 }
 0x964   :  { %v963_v55 = vpop.f32.mrf.mxu1 }
 0x965   :  { %v964_v26 = vadd.f32 %v963_v55, %v938_v10 }
 0x967   :  { %v968_v59 = vmax.f32 %v964_v26, 0.0 }
 0x96c   :  { %v965_v42 = vpop.f32.mrf.mxu1 }
 0x96d   :  { %v966_v0 = vadd.f32 %v965_v42, %v938_v10 }
 0x96f   :  { %v969_v22 = vmax.f32 %v966_v0, 0.0 }
 0x971   :  { %v970_v31 = vpack.c.bf16 %v969_v22, %v968_v59 }
 0x973   :  { %1044 = vmatmul.bf16.vlgmr.msra.gmra.mxu2 %v970_v31 }
 0x9f6   :  { %v1045_v16 = vpop.f32.mrf.mxu2 }
 0x9f7   :  { %v1046_v3 = vadd.f32 %v1045_v16, %v987_v11 }
 0x9f9   :  { %v1050_v21 = vadd.f32 %v1046_v3, %v929_v30 }
 0x9fb   :  { %v1052_v20 = vsel %vm64_vm0, %v1050_v21, 0.0 }
 0x9fc   :  { %1053 = vadd.xlane.f32.xlu2 %v1052_v20 }
 0x9fe   :  { %v1047_v2 = vpop.f32.mrf.mxu2 }
 0x9ff   :  { %v1048_v4 = vadd.f32 %v1047_v2, %v987_v11 }
 0xa01   :  { %v1051_v6 = vadd.f32 %v1048_v4, %v930_v58 }
 0xa03   :  { %v1055_v37 = vsel %vm64_vm0, %v1051_v6, 0.0 }
 0xa04   :  { %1056 = vadd.xlane.f32.xlu0 %v1055_v37 }
 0xa6f   :  { %v1054_v39 = vpop.xlane.xlu2 %1053 }
 0xa70   :  { %v1058_v5 = vmul.f32 %v1054_v39, %v1747_v34 }
 0xa72   :  { %v1060_v41 = vsub.f32 %v1050_v21, %v1058_v5 }
 0xa74   :  { %v1062_v36 = vmul.f32 %v1060_v41, %v1060_v41 }
 0xa76   :  { %v1064_v56 = vsel %vm64_vm0, %v1062_v36, 0.0 }
 0xa77   :  { %v1057_v43 = vpop.xlane.xlu0 %1056  ;;  %1065 = vadd.xlane.f32.xlu2 %v1064_v56 }
 0xa78   :  { %v1059_v35 = vmul.f32 %v1057_v43, %v1747_v34 }
 0xa7a   :  { %v1061_v13 = vsub.f32 %v1051_v6, %v1059_v35 }
 0xa7c   :  { %v1063_v44 = vmul.f32 %v1061_v13, %v1061_v13 }
 0xa7e   :  { %v1067_v14 = vsel %vm64_vm0, %v1063_v44, 0.0 }
 0xa7f   :  { %1068 = vadd.xlane.f32.xlu0 %v1067_v14 }
 0xaea   :  { %v1066_v7 = vpop.xlane.xlu2 %1065 }
 0xaeb   :  { %v1070_v8 = vmul.f32 %v1066_v7, %v1747_v34 }
 0xaed   :  { %v1072_v45 = vadd.f32 1e-05, %v1070_v8 }
 0xaef   :  { %1394 = vrsqrt.f32 %v1072_v45  ;;  %vm1080_vm15 = vweird.f32 %v1072_v45 }
 0xaf2   :  { %v1069_v46 = vpop.xlane.xlu0 %1068 }
 0xaf3   :  { %v1071_v18 = vmul.f32 %v1069_v46, %v1747_v34  ;;  %v1099_v34 = vperm.slane %v1777_v1, 5 }
 0xaf5   :  { %v1395_v19 = vpop.eup %1394  ;;  %v1073_v47 = vadd.f32 1e-05, %v1071_v18 }
 0xaf6   :  { %v1075_v38 = vmul.f32 %v1395_v19, %v1072_v45  ;;  %vm1081_vm14 = vweird.f32 %v1395_v19 }
 0xaf7   :  { %1396 = vrsqrt.f32 %v1073_v47  ;;  %vm1082_vm1 = vmor %vm1080_vm15, %vm1081_vm14  ;;  %vm1090_vm3 = vweird.f32 %v1073_v47 }
 0xaf8   :  { %v1076_v48 = vmul.f32 %v1395_v19, %v1075_v38 }
 0xafa   :  { %v1077_v12 = vmul.f32 0.5, %v1076_v48 }
 0xafc   :  { %v1078_v15 = vsub.f32 1.5, %v1077_v12 }
 0xafd   :  { %v1397_v17 = vpop.eup %1396 }
 0xafe   :  { %v1079_v49 = vmul.f32 %v1395_v19, %v1078_v15  ;;  %v1085_v50 = vmul.f32 %v1397_v17, %v1073_v47  ;;  %vm1091_vm2 = vweird.f32 %v1397_v17 }
 0xaff   :  { %vm1092_vm4 = vmor %vm1090_vm3, %vm1091_vm2 }
 0xb00   :  { %v1083_v25 = vsel %vm1082_vm1, %v1395_v19, %v1079_v49  ;;  %v1086_v53 = vmul.f32 %v1397_v17, %v1085_v50 }
 0xb01   :  { %v1094_v54 = vmul.f32 %v1083_v25, %v1060_v41 }
 0xb02   :  { %v1087_v27 = vmul.f32 0.5, %v1086_v53 }
 0xb03   :  { %v1097_v62 = vmul.f32 %v1096_v24, %v1094_v54 }
 0xb04   :  { %v1088_v28 = vsub.f32 1.5, %v1087_v27 }
 0xb05   :  { %v1100_v57 = vadd.f32 %v1099_v34, %v1097_v62 }
 0xb06   :  { %v1089_v32 = vmul.f32 %v1397_v17, %v1088_v28 }
 0xb07   :  { %1102 = vst.msk [vmem:[#allocation2] sm:$0xff] %vm64_vm0, %v1100_v57 }
 0xb08   :  { %v1093_v29 = vsel %vm1092_vm4, %v1397_v17, %v1089_v32 }
 0xb09   :  { %v1095_v33 = vmul.f32 %v1093_v29, %v1061_v13 }
 0xb0b   :  { %v1098_v23 = vmul.f32 %v1096_v24, %v1095_v33 }
 0xb0d   :  { %v1101_v1 = vadd.f32 %v1099_v34, %v1098_v23 }
 0xb0f   :  { %1103 = vst.msk [vmem:[#allocation2 + $0x8] sm:$0xff] %vm64_vm0, %v1101_v1 }
 0xb10   :  { %1116 = dma.vmem_to_hbm [thread:$0]  %s1109_s3, 256, %s1111_s17, [#allocation3], %s1430_s18, %s1430_s18, %s1431_s19  }
 0xb11   :  { %1423 = dma.done.wait [#allocation3], 256  }
 0xb12   :  { %1424 = vsyncadd [#allocation3], 4294967040 }
 0xb13   :  { %1121 = vsyncpa [#allocation3], 1 }

</bundles_post_ra>
